<compile_context>
chip_gen: v7x
topology: tpu7x:2x2x1
jax: 0.10.0
libtpu: 0.0.40
codegen_flags: <defaults>
</compile_context>

<pallas_src>
import functools

import jax
import jax.numpy as jnp
from jax.experimental import pallas as pl
from jax.experimental.pallas import tpu as pltpu


# ----------------------------------------------------------------------------
# Pallas kernels
# ----------------------------------------------------------------------------

def _mm_bn_relu_kernel(a_ref, b_ref, g_ref, bt_ref, o_ref, *, valid_rows):
    """o = ReLU(BN(A @ B)) with BN batch stats over the first `valid_rows` rows.

    Grid = (n, k); k is the reduction axis.  o_ref (f32) is the accumulator
    (same output block for every k), BN+ReLU is applied on the last k step.
    """
    k = pl.program_id(1)

    @pl.when(k == 0)
    def _():
        o_ref[...] = jnp.zeros_like(o_ref)

    o_ref[...] += jnp.dot(a_ref[...], b_ref[...],
                          preferred_element_type=jnp.float32)

    @pl.when(k == pl.num_programs(1) - 1)
    def _():
        acc = o_ref[...]                                   # (Mp, TN) f32
        mp = acc.shape[0]
        cnt = float(valid_rows)
        if valid_rows < mp:                                # mask padded rows
            rows = jax.lax.broadcasted_iota(jnp.int32, acc.shape, 0)
            valid = rows < valid_rows
            xs = jnp.where(valid, acc, 0.0)
        else:
            valid = None
            xs = acc
        mean = jnp.sum(xs, axis=0, keepdims=True) / cnt
        diff = acc - mean
        dm = jnp.where(valid, diff, 0.0) if valid is not None else diff
        var = jnp.sum(dm * dm, axis=0, keepdims=True) / cnt
        inv = jax.lax.rsqrt(var + 1e-5)
        y = diff * inv * g_ref[...] + bt_ref[...]
        o_ref[...] = jnp.maximum(y, 0.0)


def _mm_bias_sigmoid_kernel(a_ref, b_ref, bias_ref, o_ref):
    """o = sigmoid(A @ B + bias), sigmoid fused in the last-K epilogue."""
    k = pl.program_id(1)

    @pl.when(k == 0)
    def _():
        o_ref[...] = jnp.zeros_like(o_ref)

    o_ref[...] += jnp.dot(a_ref[...], b_ref[...],
                          preferred_element_type=jnp.float32)

    @pl.when(k == pl.num_programs(1) - 1)
    def _():
        x = o_ref[...] + bias_ref[...]
        z = jnp.exp(-jnp.abs(x))                           # numerically stable
        o_ref[...] = jnp.where(x >= 0.0, 1.0 / (1.0 + z), z / (1.0 + z))


def _maxpool_kernel(x_ref, o_ref):
    """2x2/stride-2 max-pool.  x: (N*H/2, 2, W/2, 2, C) -> (N*H/2, W/2, C)."""
    x = x_ref[...]
    m = jnp.max(x, axis=3)       # pool over the W pair (sublane axis)
    o_ref[...] = jnp.max(m, axis=1)  # pool over the H pair


def _avgpool_kernel(x_ref, o_ref):
    """AdaptiveAvgPool2d(1): mean over the flattened spatial axis."""
    o_ref[...] = jnp.mean(x_ref[...].astype(jnp.float32), axis=1).astype(o_ref.dtype)


# ----------------------------------------------------------------------------
# Pallas wrappers
# ----------------------------------------------------------------------------

def _round_up(v, m):
    return ((v + m - 1) // m) * m


def _pick_tk(K):
    """K tile: a multiple of 128; single step up to 1536, else a divisor."""
    kp = _round_up(K, 128)
    tiles = kp // 128
    max_tiles = 12                       # TK <= 1536
    if tiles <= max_tiles:
        return kp
    for t in range(max_tiles, 0, -1):
        if tiles % t == 0:
            return t * 128
    return 128


def _fused_matmul(kernel_fn, a, b, aux):
    """out = epilogue(A @ B), A:(M,K) B:(K,N), aux: list of (N,) f32 vectors.

    A/B are zero-padded to (8,128)-friendly shapes and cast to bf16 for the
    MXU; the accumulator / epilogue / output stay f32.
    """
    M, K = a.shape
    K2, N = b.shape
    assert K == K2
    TK = _pick_tk(K)
    Kp = _round_up(K, TK)
    Mp = _round_up(M, 8)
    Np = _round_up(N, 128)
    TN = min(Np, 256)
    if Np % TN != 0:
        TN = 128

    a_p = jnp.pad(a.astype(jnp.float32), ((0, Mp - M), (0, Kp - K))).astype(jnp.bfloat16)
    b_p = jnp.pad(b.astype(jnp.float32), ((0, Kp - K), (0, Np - N))).astype(jnp.bfloat16)
    aux_p = [jnp.pad(v.astype(jnp.float32).reshape(1, -1), ((0, 0), (0, Np - N)))
             for v in aux]

    in_specs = [
        pl.BlockSpec((Mp, TK), lambda n, k: (0, k)),
        pl.BlockSpec((TK, TN), lambda n, k: (k, n)),
    ] + [pl.BlockSpec((1, TN), lambda n, k: (0, n)) for _ in aux_p]

    out = pl.pallas_call(
        kernel_fn,
        out_shape=jax.ShapeDtypeStruct((Mp, Np), jnp.float32),
        grid_spec=pltpu.PrefetchScalarGridSpec(
            num_scalar_prefetch=0,
            grid=(Np // TN, Kp // TK),
            in_specs=in_specs,
            out_specs=pl.BlockSpec((Mp, TN), lambda n, k: (0, n)),
        ),
        compiler_params=pltpu.CompilerParams(
            dimension_semantics=("parallel", "arbitrary")),
    )(a_p, b_p, *aux_p)
    return out[:M, :N]


def pallas_maxpool2x2(x_nhwc):
    N, H, W, C = x_nhwc.shape
    # Free, contiguous reshape: x5[ni, a, j, b, c] = x[n, 2i+a, 2j+b, c].
    x5 = x_nhwc.reshape(N * (H // 2), 2, W // 2, 2, C)
    out = pl.pallas_call(
        _maxpool_kernel,
        out_shape=jax.ShapeDtypeStruct((N * (H // 2), W // 2, C), x_nhwc.dtype),
    )(x5)
    return out.reshape(N, H // 2, W // 2, C)


def pallas_global_avgpool(x_nhwc):
    N, H, W, C = x_nhwc.shape
    xr = x_nhwc.reshape(N, H * W, C)
    return pl.pallas_call(
        _avgpool_kernel,
        out_shape=jax.ShapeDtypeStruct((N, C), x_nhwc.dtype),
    )(xr)


# ----------------------------------------------------------------------------
# Layer compositions (im2col glue + fused Pallas compute)
# ----------------------------------------------------------------------------

def _im2col_3x3_pad1(x_nhwc):
    """(N,H,W,C) -> (N*H*W, 9*C), column order (dy, dx, c) — matches weight
    reshape of (3,3,Cin,Cout) -> (9*Cin, Cout)."""
    N, H, W, C = x_nhwc.shape
    xp = jnp.pad(x_nhwc, ((0, 0), (1, 1), (1, 1), (0, 0)))
    cols = []
    for dy in range(3):
        for dx in range(3):
            cols.append(xp[:, dy:dy + H, dx:dx + W, :])
    patches = jnp.concatenate(cols, axis=-1)        # (N, H, W, 9*C)
    return patches.reshape(N * H * W, 9 * C)


def conv_bn_relu(x_nhwc, w_hwio, gamma, beta):
    """Conv2d(k=3, s=1, p=1, bias=False) + BatchNorm2d(batch stats) + ReLU."""
    N, H, W, Cin = x_nhwc.shape
    Cout = w_hwio.shape[-1]
    a = _im2col_3x3_pad1(x_nhwc)                    # (N*H*W, 9*Cin)
    w2 = w_hwio.reshape(9 * Cin, Cout)
    kern = functools.partial(_mm_bn_relu_kernel, valid_rows=N * H * W)
    y = _fused_matmul(kern, a, w2, [gamma, beta])
    return y.reshape(N, H, W, Cout)


def fc_bn_relu(x2d, w_io, gamma, beta):
    """Linear + BatchNorm1d(batch stats) + ReLU.

    The Linear bias is mathematically cancelled by batch-stat BN, so it is
    not applied (exact equivalence to the PyTorch module)."""
    kern = functools.partial(_mm_bn_relu_kernel, valid_rows=x2d.shape[0])
    return _fused_matmul(kern, x2d, w_io, [gamma, beta])


# ----------------------------------------------------------------------------
# BasicNet parameters + forward
# ----------------------------------------------------------------------------

CONV_PLAN = [(3, 64), (64, 128), (128, 128), (128, 256),
             (256, 256), (256, 512), (512, 512)]


def init_params(key, task_groups):
    params = {"conv_w": [], "conv_g": [], "conv_b": [],
              "fc_w": [], "fc_b": [], "fc_g": [], "fc_beta": [],
              "head_w": [], "head_b": []}

    def nrm(k, shape, scale):
        return jax.random.normal(k, shape, jnp.float32) * scale

    for cin, cout in CONV_PLAN:
        key, k1, k2, k3 = jax.random.split(key, 4)
        fan_in = 9 * cin
        params["conv_w"].append(nrm(k1, (3, 3, cin, cout), (2.0 / fan_in) ** 0.5))
        params["conv_g"].append(1.0 + 0.1 * jax.random.normal(k2, (cout,), jnp.float32))
        params["conv_b"].append(0.1 * jax.random.normal(k3, (cout,), jnp.float32))

    for _ in range(2):
        key, k1, k2, k3, k4 = jax.random.split(key, 5)
        params["fc_w"].append(nrm(k1, (512, 512), (2.0 / 512) ** 0.5))
        # fc bias kept for parity with the PyTorch module; it cancels under
        # batch-stat BN and is therefore unused in compute.
        params["fc_b"].append(0.05 * jax.random.normal(k2, (512,), jnp.float32))
        params["fc_g"].append(1.0 + 0.1 * jax.random.normal(k3, (512,), jnp.float32))
        params["fc_beta"].append(0.1 * jax.random.normal(k4, (512,), jnp.float32))

    for group in task_groups:
        d = len(group)
        key, k1, k2 = jax.random.split(key, 3)
        params["head_w"].append(nrm(k1, (512, d), (1.0 / 512) ** 0.5))
        params["head_b"].append(0.05 * jax.random.normal(k2, (d,), jnp.float32))
    return params


def basicnet_forward(x_nchw, params, n_tasks):
    """Equivalent of BasicNet.forward(x, task=None): returns list of per-task
    sigmoid outputs."""
    x = jnp.transpose(x_nchw, (0, 2, 3, 1)).astype(jnp.float32)  # NCHW -> NHWC

    cw, cg, cb = params["conv_w"], params["conv_g"], params["conv_b"]
    # backbone
    x = conv_bn_relu(x, cw[0], cg[0], cb[0])      # CONV_1
    x = pallas_maxpool2x2(x)                      # POOL_1
    x = conv_bn_relu(x, cw[1], cg[1], cb[1])      # CONV_2
    x = conv_bn_relu(x, cw[2], cg[2], cb[2])      # CONV_3
    x = pallas_maxpool2x2(x)                      # POOL_2
    x = conv_bn_relu(x, cw[3], cg[3], cb[3])      # CONV_4
    x = conv_bn_relu(x, cw[4], cg[4], cb[4])      # CONV_5
    x = pallas_maxpool2x2(x)                      # POOL_3
    x = conv_bn_relu(x, cw[5], cg[5], cb[5])      # CONV_6
    x = conv_bn_relu(x, cw[6], cg[6], cb[6])      # CONV_7
    feat = pallas_global_avgpool(x)               # POOL_4 (AdaptiveAvgPool2d(1))
    feat = feat.reshape(feat.shape[0], -1)        # view(N, -1)

    # shared FC trunk
    for i in range(2):
        feat = fc_bn_relu(feat, params["fc_w"][i],
                          params["fc_g"][i], params["fc_beta"][i])

    # task heads: single merged matmul + fused bias + sigmoid, split in JAX.
    w_all = jnp.concatenate(params["head_w"], axis=1)     # (512, sum_d)
    b_all = jnp.concatenate(params["head_b"], axis=0)     # (sum_d,)
    y_all = _fused_matmul(_mm_bias_sigmoid_kernel, feat, w_all, [b_all])

    outs, off = [], 0
    for t in range(n_tasks):
        d = params["head_w"][t].shape[1]
        outs.append(y_all[:, off:off + d])
        off += d
    return outs


# ----------------------------------------------------------------------------
# main
# ----------------------------------------------------------------------------

if __name__ == "__main__":
    task_groups = [[0, 1], [2, 3, 4]]     # 2 tasks, output dims 2 and 3
    n_tasks = len(task_groups)

    key = jax.random.PRNGKey(0)
    key, pkey, xkey = jax.random.split(key, 3)
    params = init_params(pkey, task_groups)

    # Input in PyTorch NCHW convention: (batch=2, channels=3, 16, 16)
    x = jax.random.normal(xkey, (2, 3, 16, 16), jnp.float32)

    outs = basicnet_forward(x, params, n_tasks)
    outs = [jax.block_until_ready(o) for o in outs]

    assert outs[0].shape == (2, 2) and outs[1].shape == (2, 3)
    assert all(bool(jnp.all(jnp.isfinite(o))) for o in outs)
    assert all(bool(jnp.all((o >= 0.0) & (o <= 1.0))) for o in outs)
    print("KERNEL_OK")
</pallas_src>

<mosaic_0001>
module attributes {stable_mosaic.version = 11 : i64} {
  func.func @_mm_bn_relu_kernel(%arg0: i32, %arg1: i32, %arg2: memref<512x128xbf16, #tpu.memory_space<vmem>>, %arg3: memref<128x128xbf16, #tpu.memory_space<vmem>>, %arg4: memref<1x128xf32, #tpu.memory_space<vmem>>, %arg5: memref<1x128xf32, #tpu.memory_space<vmem>>, %arg6: memref<512x128xf32, #tpu.memory_space<vmem>>) attributes {dimension_semantics = [#tpu.dimension_semantics<parallel>, #tpu.dimension_semantics<arbitrary>], iteration_bounds = array<i64: 1, 1>, scalar_prefetch = 0 : i64, scratch_operands = 0 : i64, tpu.core_type = #tpu.core_type<tc>, window_params = [{transform_indices = @transform_0, window_bounds = array<i64: 512, 128>}, {transform_indices = @transform_1, window_bounds = array<i64: 128, 128>}, {transform_indices = @transform_2, window_bounds = array<i64: 1, 128>}, {transform_indices = @transform_3, window_bounds = array<i64: 1, 128>}, {transform_indices = @transform_4, window_bounds = array<i64: 512, 128>}]} {
    %c0_i32 = arith.constant 0 : i32
    %0 = arith.cmpi eq, %arg1, %c0_i32 : i32
    %1 = arith.extui %0 : i1 to i32
    %c0_i32_0 = arith.constant 0 : i32
    %2 = arith.cmpi ne, %1, %c0_i32_0 : i32
    scf.if %2 {
      %cst_10 = arith.constant 0.000000e+00 : f32
      %12 = vector.broadcast %cst_10 : f32 to vector<512x128xf32>
      %c0_11 = arith.constant 0 : index
      %c0_12 = arith.constant 0 : index
      %13 = vector.load %arg6[%c0_11, %c0_12] : memref<512x128xf32, #tpu.memory_space<vmem>>, vector<512x128xf32>
      tpu.vector_store %arg6[%c0_11, %c0_12], %12 {strides = array<i32>} : memref<512x128xf32, #tpu.memory_space<vmem>>, vector<512x128xf32>,
    } else {
    }
    %c0 = arith.constant 0 : index
    %c0_1 = arith.constant 0 : index
    %3 = vector.load %arg6[%c0, %c0_1] : memref<512x128xf32, #tpu.memory_space<vmem>>, vector<512x128xf32>
    %c0_2 = arith.constant 0 : index
    %c0_3 = arith.constant 0 : index
    %4 = vector.load %arg2[%c0_2, %c0_3] : memref<512x128xbf16, #tpu.memory_space<vmem>>, vector<512x128xbf16>
    %c0_4 = arith.constant 0 : index
    %c0_5 = arith.constant 0 : index
    %5 = vector.load %arg3[%c0_4, %c0_5] : memref<128x128xbf16, #tpu.memory_space<vmem>>, vector<128x128xbf16>
    %cst = arith.constant dense<0.000000e+00> : vector<512x128xf32>
    %6 = tpu.matmul %4, %5, %cst {dimension_numbers = #tpu.dot_dimension_numbers<[1], [0], [0], [1], [0, 0, 1, 1], [], []>} : vector<512x128xbf16>, vector<128x128xbf16>, vector<512x128xf32> -> vector<512x128xf32>
    %7 = arith.addf %3, %6 : vector<512x128xf32>
    %c0_6 = arith.constant 0 : index
    %c0_7 = arith.constant 0 : index
    %8 = vector.load %arg6[%c0_6, %c0_7] : memref<512x128xf32, #tpu.memory_space<vmem>>, vector<512x128xf32>
    tpu.vector_store %arg6[%c0_6, %c0_7], %7 {strides = array<i32>} : memref<512x128xf32, #tpu.memory_space<vmem>>, vector<512x128xf32>,
    %c0_i32_8 = arith.constant 0 : i32
    %9 = arith.cmpi eq, %arg1, %c0_i32_8 : i32
    %10 = arith.extui %9 : i1 to i32
    %c0_i32_9 = arith.constant 0 : i32
    %11 = arith.cmpi ne, %10, %c0_i32_9 : i32
    scf.if %11 {
      %c0_10 = arith.constant 0 : index
      %c0_11 = arith.constant 0 : index
      %12 = vector.load %arg6[%c0_10, %c0_11] : memref<512x128xf32, #tpu.memory_space<vmem>>, vector<512x128xf32>
      %cst_12 = arith.constant dense<0.000000e+00> : vector<128xf32>
      %13 = vector.multi_reduction <add>, %12, %cst_12 [0] : vector<512x128xf32> to vector<128xf32>
      %14 = vector.shape_cast %13 : vector<128xf32> to vector<1x128xf32>
      %cst_13 = arith.constant 5.120000e+02 : f32
      %15 = vector.broadcast %cst_13 : f32 to vector<1x128xf32>
      %16 = arith.divf %14, %15 : vector<1x128xf32>
      %17 = vector.broadcast %16 : vector<1x128xf32> to vector<512x128xf32>
      %18 = arith.subf %12, %17 : vector<512x128xf32>
      %19 = arith.mulf %18, %18 : vector<512x128xf32>
      %cst_14 = arith.constant dense<0.000000e+00> : vector<128xf32>
      %20 = vector.multi_reduction <add>, %19, %cst_14 [0] : vector<512x128xf32> to vector<128xf32>
      %21 = vector.shape_cast %20 : vector<128xf32> to vector<1x128xf32>
      %cst_15 = arith.constant 5.120000e+02 : f32
      %22 = vector.broadcast %cst_15 : f32 to vector<1x128xf32>
      %23 = arith.divf %21, %22 : vector<1x128xf32>
      %cst_16 = arith.constant 9.99999974E-6 : f32
      %24 = vector.broadcast %cst_16 : f32 to vector<1x128xf32>
      %25 = arith.addf %23, %24 : vector<1x128xf32>
      %26 = math.rsqrt %25 : vector<1x128xf32>
      %27 = vector.broadcast %26 : vector<1x128xf32> to vector<512x128xf32>
      %28 = arith.mulf %18, %27 : vector<512x128xf32>
      %c0_17 = arith.constant 0 : index
      %c0_18 = arith.constant 0 : index
      %29 = vector.load %arg4[%c0_17, %c0_18] : memref<1x128xf32, #tpu.memory_space<vmem>>, vector<1x128xf32>
      %30 = vector.broadcast %29 : vector<1x128xf32> to vector<512x128xf32>
      %31 = arith.mulf %28, %30 : vector<512x128xf32>
      %c0_19 = arith.constant 0 : index
      %c0_20 = arith.constant 0 : index
      %32 = vector.load %arg5[%c0_19, %c0_20] : memref<1x128xf32, #tpu.memory_space<vmem>>, vector<1x128xf32>
      %33 = vector.broadcast %32 : vector<1x128xf32> to vector<512x128xf32>
      %34 = arith.addf %31, %33 : vector<512x128xf32>
      %cst_21 = arith.constant 0.000000e+00 : f32
      %35 = vector.broadcast %cst_21 : f32 to vector<512x128xf32>
      %36 = arith.maximumf %34, %35 : vector<512x128xf32>
      %c0_22 = arith.constant 0 : index
      %c0_23 = arith.constant 0 : index
      %37 = vector.load %arg6[%c0_22, %c0_23] : memref<512x128xf32, #tpu.memory_space<vmem>>, vector<512x128xf32>
      tpu.vector_store %arg6[%c0_22, %c0_23], %36 {strides = array<i32>} : memref<512x128xf32, #tpu.memory_space<vmem>>, vector<512x128xf32>,
    } else {
    }
    return
  }
  func.func @transform_0(%arg0: i32, %arg1: i32) -> (i32, i32) {
    %c0_i32 = arith.constant 0 : i32
    %c0_i32_0 = arith.constant 0 : i32
    return %c0_i32, %arg1 : i32, i32
  }
  func.func @transform_1(%arg0: i32, %arg1: i32) -> (i32, i32) {
    %c0_i32 = arith.constant 0 : i32
    return %arg1, %arg0 : i32, i32
  }
  func.func @transform_2(%arg0: i32, %arg1: i32) -> (i32, i32) {
    %c0_i32 = arith.constant 0 : i32
    %c0_i32_0 = arith.constant 0 : i32
    return %c0_i32, %arg0 : i32, i32
  }
  func.func @transform_3(%arg0: i32, %arg1: i32) -> (i32, i32) {
    %c0_i32 = arith.constant 0 : i32
    %c0_i32_0 = arith.constant 0 : i32
    return %c0_i32, %arg0 : i32, i32
  }
  func.func @transform_4(%arg0: i32, %arg1: i32) -> (i32, i32) {
    %c0_i32 = arith.constant 0 : i32
    %c0_i32_0 = arith.constant 0 : i32
    return %c0_i32, %arg0 : i32, i32
  }
}

</mosaic_0001>

<bundles_post_ra>
// kernel: tpu_custom_call.1
= control target key start
LH: loop header
LB: loop body
LE: loop exit
PB: predicated region body
PF: predicated region fallthrough
CT: control target
= control target key end

     0   :  { %9 = vsyncpa [#allocation3], 0  ;;  %s3390_s0 = inlined_call_operand.hbm [shape: bf16[512,128], index: 0, kind: input, shape index: {}]   ;;  %s3391_s1 = inlined_call_operand.hbm [shape: bf16[128,128], index: 1, kind: input, shape index: {}]   ;;  %s3392_s2 = inlined_call_operand.vmem [shape: f32[1,128], index: 2, kind: input, shape index: {}]   ;;  %s3393_s3 = inlined_call_operand.vmem [shape: f32[1,128], index: 3, kind: input, shape index: {}]   ;;  %s3394_s4 = inlined_call_operand.hbm [shape: f32[512,128], index: 4, kind: output, shape index: {}]  }
   0x1   :  { %10 = vsyncpa [#allocation6], 0 }
   0x2   :  { %11 = vsyncpa [#allocation4], 0  ;;  %s1906_s15 = smov [#allocation2]   ;;  %s1834_s19 = scalar_lea.hbm %s3390_s0, 4096 }
   0x3   :  { %s17_s16 = sshll.u32 %s1906_s15, 4  ;;  %p1835_p0 = scmp.ne.s32.totalorder %s3390_s0, %s1834_s19  ;;  %s18_s16 = int_to_ptr.vmem [resolvable:$true] %s17_s16 }
   0x4   :  { %p1838_p1 = scmp.lt.u32.totalorder %s1834_s19, %s3390_s0 }
   0x6   :  { %p1840_p2 = pnand %p1838_p1, %p1835_p0 }
   0x8   :  { %1843 = shalt.err (!%p1840_p2)
}
   0x9   :  { %s1844_s24 = scalar_lea.vmem %s18_s16, 4096  ;;  %p1849_p4 = scmp.lt.s32.totalorder %s18_s16, %s18_s16 }
   0xa   :  { %p1845_p3 = scmp.ne.s32.totalorder %s18_s16, %s1844_s24  ;;  %p1850_p5 = scmp.lt.s32.totalorder %s1844_s24, %s1844_s24 }
   0xc   :  { %p1851_p6 = por %p1850_p5, %p1849_p4 }
   0xe   :  { %p1852_p7 = pnand %p1851_p6, %p1845_p3 }
  0x10   :  { %1855 = shalt.err (!%p1852_p7)
}
  0x11   :  { %s1907_s25 = smov 64   ;;  %s1908_s26 = smov 4  }
  0x12   :  { %23 = dma.hbm_to_vmem [thread:$0]  %s3390_s0, 4096, %s18_s16, [#allocation3], %s1907_s25, %s1907_s25, %s1908_s26  }
  0x13   :  { %s1909_s29 = smov [#allocation5]   ;;  %s1856_s7 = scalar_lea.hbm %s3391_s1, 1024 }
  0x14   :  { %s29_s30 = sshll.u32 %s1909_s29, 4  ;;  %p1857_p8 = scmp.ne.s32.totalorder %s3391_s1, %s1856_s7  ;;  %s30_s30 = int_to_ptr.vmem [resolvable:$true] %s29_s30 }
  0x15   :  { %p1860_p9 = scmp.lt.u32.totalorder %s1856_s7, %s3391_s1 }
  0x17   :  { %p1862_p10 = pnand %p1860_p9, %p1857_p8 }
  0x19   :  { %1865 = shalt.err (!%p1862_p10)
}
  0x1a   :  { %s1866_s12 = scalar_lea.vmem %s30_s30, 1024  ;;  %p1871_p12 = scmp.lt.s32.totalorder %s30_s30, %s30_s30 }
  0x1b   :  { %p1867_p11 = scmp.ne.s32.totalorder %s30_s30, %s1866_s12  ;;  %p1872_p13 = scmp.lt.s32.totalorder %s1866_s12, %s1866_s12 }
  0x1d   :  { %p1873_p0 = por %p1872_p13, %p1871_p12 }
  0x1f   :  { %p1874_p1 = pnand %p1873_p0, %p1867_p11 }
  0x21   :  { %1877 = shalt.err (!%p1874_p1)
}
  0x22   :  { %35 = dma.hbm_to_vmem [thread:$0]  %s3391_s1, 1024, %s30_s30, [#allocation6], %s1907_s25, %s1907_s25, %s1908_s26  }
  0x23   :  { %1900 = dma.done.wait [#allocation3], 4096  }
  0x24   :  { %1901 = vsyncadd [#allocation3], 4294963200 }
  0x25   :  { %1902 = dma.done.wait [#allocation6], 1024  }
  0x26   :  { %1903 = vsyncadd [#allocation6], 4294966272  ;;  %v1792_v0 = vld [vmem:[#allocation5] sm:$0xff]   ;;  %v1793_v1 = vld [vmem:[#allocation5 + $0x8] sm:$0xff]  }
  0x27   :  { %1688 = vmatprep.subr.bf16.mxu0 %v1792_v0  ;;  %1768 = vmatprep.subr.bf16.mxu1 %v1792_v0  ;;  %v1794_v2 = vld [vmem:[#allocation5 + $0x10] sm:$0xff]   ;;  %v1795_v3 = vld [vmem:[#allocation5 + $0x18] sm:$0xff]   ;;  %v1800_v4 = vld [vmem:[#allocation2] sm:$0xff]  }
  0x28   :  { %1689 = vmatpush3.bf16.msra.mxu0 %v1792_v0  ;;  %1776 = vmatpush3.bf16.msra.mxu1 %v1792_v0  ;;  %v1796_v5 = vld [vmem:[#allocation5 + $0x20] sm:$0xff]   ;;  %v1797_v6 = vld [vmem:[#allocation5 + $0x28] sm:$0xff]   ;;  %v1798_v7 = vld [vmem:[#allocation5 + $0x30] sm:$0xff]  }
  0x29   :  { %1690 = vmatprep.subr.bf16.mxu0 %v1793_v1  ;;  %1769 = vmatprep.subr.bf16.mxu1 %v1793_v1  ;;  %v1799_v8 = vld [vmem:[#allocation5 + $0x38] sm:$0xff]   ;;  %v1816_v9 = vld [vmem:[#allocation2 + $0x80] sm:$0xff]   ;;  %v1801_v10 = vld [vmem:[#allocation2 + $0x8] sm:$0xff]  }
  0x2a   :  { %1704 = vmatprep.mubr.bf16.mxu0 %v1800_v4  ;;  %1736 = vmatprep.mubr.bf16.mxu1 %v1816_v9  ;;  %v1802_v11 = vld [vmem:[#allocation2 + $0x10] sm:$0xff]   ;;  %v1817_v12 = vld [vmem:[#allocation2 + $0x88] sm:$0xff]   ;;  %v1803_v14 = vld [vmem:[#allocation2 + $0x18] sm:$0xff]  }
  0x2b   :  { %v1818_v13 = vld [vmem:[#allocation2 + $0x90] sm:$0xff]   ;;  %v1804_v15 = vld [vmem:[#allocation2 + $0x20] sm:$0xff]   ;;  %v1819_v16 = vld [vmem:[#allocation2 + $0x98] sm:$0xff]  }
  0x2c   :  { %1691 = vmatpush3.bf16.msra.mxu0 %v1793_v1  ;;  %1777 = vmatpush3.bf16.msra.mxu1 %v1793_v1  ;;  %v1820_v17 = vld [vmem:[#allocation2 + $0xa0] sm:$0xff]   ;;  %v1805_v18 = vld [vmem:[#allocation2 + $0x28] sm:$0xff]   ;;  %v1806_v20 = vld [vmem:[#allocation2 + $0x30] sm:$0xff]  }
  0x2d   :  { %1692 = vmatprep.subr.bf16.mxu0 %v1794_v2  ;;  %1770 = vmatprep.subr.bf16.mxu1 %v1794_v2  ;;  %v1821_v19 = vld [vmem:[#allocation2 + $0xa8] sm:$0xff]   ;;  %v1822_v21 = vld [vmem:[#allocation2 + $0xb0] sm:$0xff]   ;;  %v1807_v22 = vld [vmem:[#allocation2 + $0x38] sm:$0xff]  }
  0x2e   :  { %v1823_v23 = vld [vmem:[#allocation2 + $0xb8] sm:$0xff]   ;;  %v1808_v24 = vld [vmem:[#allocation2 + $0x40] sm:$0xff]   ;;  %v1809_v26 = vld [vmem:[#allocation2 + $0x48] sm:$0xff]  }
  0x2f   :  { %v1824_v25 = vld [vmem:[#allocation2 + $0xc0] sm:$0xff]   ;;  %v1825_v27 = vld [vmem:[#allocation2 + $0xc8] sm:$0xff]   ;;  %v1810_v28 = vld [vmem:[#allocation2 + $0x50] sm:$0xff]  }
  0x30   :  { %1693 = vmatpush3.bf16.msra.mxu0 %v1794_v2  ;;  %1778 = vmatpush3.bf16.msra.mxu1 %v1794_v2  ;;  %v1826_v29 = vld [vmem:[#allocation2 + $0xd0] sm:$0xff]   ;;  %v1811_v30 = vld [vmem:[#allocation2 + $0x58] sm:$0xff]   ;;  %v1812_v32 = vld [vmem:[#allocation2 + $0x60] sm:$0xff]  }
  0x31   :  { %1694 = vmatprep.subr.bf16.mxu0 %v1795_v3  ;;  %1771 = vmatprep.subr.bf16.mxu1 %v1795_v3  ;;  %v1827_v31 = vld [vmem:[#allocation2 + $0xd8] sm:$0xff]   ;;  %v1828_v33 = vld [vmem:[#allocation2 + $0xe0] sm:$0xff]   ;;  %v1813_v34 = vld [vmem:[#allocation2 + $0x68] sm:$0xff]  }
  0x32   :  { %v1829_v35 = vld [vmem:[#allocation2 + $0xe8] sm:$0xff]   ;;  %v1814_v36 = vld [vmem:[#allocation2 + $0x70] sm:$0xff]   ;;  %v1815_v38 = vld [vmem:[#allocation2 + $0x78] sm:$0xff]  }
  0x33   :  { %v1830_v37 = vld [vmem:[#allocation2 + $0xf0] sm:$0xff]   ;;  %v1831_v39 = vld [vmem:[#allocation2 + $0xf8] sm:$0xff]  }
  0x34   :  { %1695 = vmatpush3.bf16.msra.mxu0 %v1795_v3  ;;  %1779 = vmatpush3.bf16.msra.mxu1 %v1795_v3 }
  0x35   :  { %1696 = vmatprep.subr.bf16.mxu0 %v1796_v5  ;;  %1772 = vmatprep.subr.bf16.mxu1 %v1796_v5 }
  0x38   :  { %1697 = vmatpush3.bf16.msra.mxu0 %v1796_v5  ;;  %1780 = vmatpush3.bf16.msra.mxu1 %v1796_v5 }
  0x39   :  { %1698 = vmatprep.subr.bf16.mxu0 %v1797_v6  ;;  %1773 = vmatprep.subr.bf16.mxu1 %v1797_v6 }
  0x3c   :  { %1699 = vmatpush3.bf16.msra.mxu0 %v1797_v6  ;;  %1781 = vmatpush3.bf16.msra.mxu1 %v1797_v6 }
  0x3d   :  { %1700 = vmatprep.subr.bf16.mxu0 %v1798_v7  ;;  %1774 = vmatprep.subr.bf16.mxu1 %v1798_v7 }
  0x40   :  { %1701 = vmatpush3.bf16.msra.mxu0 %v1798_v7  ;;  %1782 = vmatpush3.bf16.msra.mxu1 %v1798_v7 }
  0x41   :  { %1702 = vmatprep.subr.bf16.mxu0 %v1799_v8  ;;  %1775 = vmatprep.subr.bf16.mxu1 %v1799_v8 }
  0x44   :  { %1703 = vmatpush3.bf16.msra.mxu0 %v1799_v8  ;;  %1783 = vmatpush3.bf16.msra.mxu1 %v1799_v8 }
  0x47   :  { %1705 = vmatmul.mubr.bf16.vlgmr.msra.gmra.mrb[0].mxu0 %v1801_v10  ;;  %1737 = vmatmul.mubr.bf16.vlgmr.msra.gmra.mrb[0].mxu1 %v1817_v12 }
  0x48   :  { %1708 = vmatprep.mubr.bf16.mxu0 %v1802_v11  ;;  %1740 = vmatprep.mubr.bf16.mxu1 %v1818_v13 }
  0x4f   :  { %1709 = vmatmul.mubr.bf16.gmra.mrb[4].mxu0 %v1803_v14  ;;  %1741 = vmatmul.mubr.bf16.gmra.mrb[4].mxu1 %v1819_v16 }
  0x50   :  { %1712 = vmatprep.mubr.bf16.mxu0 %v1804_v15  ;;  %1744 = vmatprep.mubr.bf16.mxu1 %v1820_v17 }
  0x57   :  { %1713 = vmatmul.mubr.bf16.gmra.mrb[8].mxu0 %v1805_v18  ;;  %1745 = vmatmul.mubr.bf16.gmra.mrb[8].mxu1 %v1821_v19 }
  0x58   :  { %1716 = vmatprep.mubr.bf16.mxu0 %v1806_v20  ;;  %1748 = vmatprep.mubr.bf16.mxu1 %v1822_v21 }
  0x5f   :  { %1717 = vmatmul.mubr.bf16.gmra.mrb[12].mxu0 %v1807_v22  ;;  %1749 = vmatmul.mubr.bf16.gmra.mrb[12].mxu1 %v1823_v23 }
  0x60   :  { %1720 = vmatprep.mubr.bf16.mxu0 %v1808_v24  ;;  %1752 = vmatprep.mubr.bf16.mxu1 %v1824_v25 }
  0x67   :  { %1721 = vmatmul.mubr.bf16.gmra.mrb[16].mxu0 %v1809_v26  ;;  %1753 = vmatmul.mubr.bf16.gmra.mrb[16].mxu1 %v1825_v27 }
  0x68   :  { %1724 = vmatprep.mubr.bf16.mxu0 %v1810_v28  ;;  %1756 = vmatprep.mubr.bf16.mxu1 %v1826_v29 }
  0x6f   :  { %1725 = vmatmul.mubr.bf16.gmra.mrb[20].mxu0 %v1811_v30  ;;  %1757 = vmatmul.mubr.bf16.gmra.mrb[20].mxu1 %v1827_v31 }
  0x70   :  { %1728 = vmatprep.mubr.bf16.mxu0 %v1812_v32  ;;  %1760 = vmatprep.mubr.bf16.mxu1 %v1828_v33 }
  0x77   :  { %1729 = vmatmul.mubr.bf16.gmra.mrb[24].mxu0 %v1813_v34  ;;  %1761 = vmatmul.mubr.bf16.gmra.mrb[24].mxu1 %v1829_v35 }
  0x78   :  { %1732 = vmatprep.mubr.bf16.mxu0 %v1814_v36  ;;  %1764 = vmatprep.mubr.bf16.mxu1 %v1830_v37 }
  0x7f   :  { %1733 = vmatmul.mubr.bf16.gmra.mrb[28].mxu0 %v1815_v38  ;;  %1765 = vmatmul.mubr.bf16.gmra.mrb[28].mxu1 %v1831_v39 }
 0x11a   :  { %v1962_v40 = vpop.f32.mrb[0].mxu0  ;;  %v1964_v41 = vpop.f32.mrb[0].mxu1 }
 0x11b   :  { %v1966_v42 = vpop.f32.mrb[1].mxu0  ;;  %v1968_v43 = vpop.f32.mrb[1].mxu1 }
 0x11c   :  { %v1970_v44 = vpop.f32.mrb[2].mxu0  ;;  %v1972_v45 = vpop.f32.mrb[2].mxu1 }
 0x11d   :  { %v1974_v46 = vpop.f32.mrb[3].mxu0  ;;  %v1976_v47 = vpop.f32.mrb[3].mxu1 }
 0x11e   :  { %v983_v48 = vadd.f32 %v1974_v46, %v1966_v42 }
 0x120   :  { %v984_v49 = vadd.f32 %v1962_v40, %v983_v48 }
 0x122   :  { %v1981_v50 = vpop.f32.mrb[4].mxu0  ;;  %v1983_v51 = vpop.f32.mrb[4].mxu1  ;;  %v985_v54 = vadd.f32 %v1970_v44, %v984_v49 }
 0x123   :  { %v1985_v52 = vpop.f32.mrb[5].mxu0  ;;  %v1987_v53 = vpop.f32.mrb[5].mxu1 }
 0x124   :  { %v1990_v55 = vpop.f32.mrb[6].mxu0  ;;  %v1992_v56 = vpop.f32.mrb[6].mxu1  ;;  %v986_v59 = vadd.f32 %v985_v54, %v1985_v52 }
 0x125   :  { %v1994_v57 = vpop.f32.mrb[7].mxu0  ;;  %v1996_v58 = vpop.f32.mrb[7].mxu1 }
 0x126   :  { %v987_v60 = vadd.f32 %v986_v59, %v1994_v57 }
 0x128   :  { %v988_v61 = vadd.f32 %v1981_v50, %v987_v60 }
 0x12a   :  { %v2001_v62 = vpop.f32.mrb[8].mxu0  ;;  %v2003_v63 = vpop.f32.mrb[8].mxu1  ;;  %v989_v2 = vadd.f32 %v1990_v55, %v988_v61 }
 0x12b   :  { %3430 = vst [vmem:[#allocation11_spill] sm:$0xff] %v2003_v63  ;;  %v2005_v0 = vpop.f32.mrb[9].mxu0  ;;  %v2007_v1 = vpop.f32.mrb[9].mxu1 }
 0x12c   :  { %v2010_v3 = vpop.f32.mrb[10].mxu0  ;;  %v2012_v4 = vpop.f32.mrb[10].mxu1  ;;  %v990_v7 = vadd.f32 %v989_v2, %v2005_v0 }
 0x12d   :  { %3431 = vst [vmem:[#allocation12_spill] sm:$0xff] %v2012_v4  ;;  %v2014_v5 = vpop.f32.mrb[11].mxu0  ;;  %v2016_v6 = vpop.f32.mrb[11].mxu1 }
 0x12e   :  { %3432 = vst [vmem:[#allocation13_spill] sm:$0xff] %v2016_v6  ;;  %v991_v8 = vadd.f32 %v990_v7, %v2014_v5 }
 0x130   :  { %v992_v9 = vadd.f32 %v2001_v62, %v991_v8 }
 0x132   :  { %v2021_v10 = vpop.f32.mrb[12].mxu0  ;;  %v2023_v11 = vpop.f32.mrb[12].mxu1  ;;  %v993_v14 = vadd.f32 %v2010_v3, %v992_v9 }
 0x133   :  { %v2025_v12 = vpop.f32.mrb[13].mxu0  ;;  %v2027_v13 = vpop.f32.mrb[13].mxu1 }
 0x134   :  { %3433 = vst [vmem:[#allocation14_spill] sm:$0xff] %v2027_v13  ;;  %v2030_v15 = vpop.f32.mrb[14].mxu0  ;;  %v2032_v16 = vpop.f32.mrb[14].mxu1  ;;  %v994_v19 = vadd.f32 %v993_v14, %v2025_v12 }
 0x135   :  { %v2034_v17 = vpop.f32.mrb[15].mxu0  ;;  %v2036_v18 = vpop.f32.mrb[15].mxu1 }
 0x136   :  { %v995_v20 = vadd.f32 %v994_v19, %v2034_v17 }
 0x138   :  { %v996_v21 = vadd.f32 %v2021_v10, %v995_v20 }
 0x13a   :  { %v2041_v22 = vpop.f32.mrb[16].mxu0  ;;  %v2043_v23 = vpop.f32.mrb[16].mxu1  ;;  %v997_v26 = vadd.f32 %v2030_v15, %v996_v21 }
 0x13b   :  { %3434 = vst [vmem:[#allocation15_spill] sm:$0xff] %v2041_v22  ;;  %v2045_v24 = vpop.f32.mrb[17].mxu0  ;;  %v2047_v25 = vpop.f32.mrb[17].mxu1 }
 0x13c   :  { %v2050_v27 = vpop.f32.mrb[18].mxu0  ;;  %v2052_v28 = vpop.f32.mrb[18].mxu1  ;;  %v998_v31 = vadd.f32 %v997_v26, %v2045_v24 }
 0x13d   :  { %3435 = vst [vmem:[#allocation16_spill] sm:$0xff] %v2050_v27  ;;  %v2054_v29 = vpop.f32.mrb[19].mxu0  ;;  %v2056_v30 = vpop.f32.mrb[19].mxu1 }
 0x13e   :  { %3436 = vst [vmem:[#allocation17_spill] sm:$0xff] %v2054_v29  ;;  %v999_v32 = vadd.f32 %v998_v31, %v2054_v29 }
 0x140   :  { %v1000_v33 = vadd.f32 %v2041_v22, %v999_v32 }
 0x142   :  { %v2061_v34 = vpop.f32.mrb[20].mxu0  ;;  %v2063_v35 = vpop.f32.mrb[20].mxu1  ;;  %v1001_v38 = vadd.f32 %v2050_v27, %v1000_v33 }
 0x143   :  { %3437 = vst [vmem:[#allocation18_spill] sm:$0xff] %v2061_v34  ;;  %v2065_v36 = vpop.f32.mrb[21].mxu0  ;;  %v2067_v37 = vpop.f32.mrb[21].mxu1 }
 0x144   :  { %3438 = vst [vmem:[#allocation19_spill] sm:$0xff] %v2065_v36  ;;  %v2070_v39 = vpop.f32.mrb[22].mxu0  ;;  %v2072_v48 = vpop.f32.mrb[22].mxu1  ;;  %v1002_v59 = vadd.f32 %v1001_v38, %v2065_v36 }
 0x145   :  { %3439 = vst [vmem:[#allocation20_spill] sm:$0xff] %v2070_v39  ;;  %v2074_v49 = vpop.f32.mrb[23].mxu0  ;;  %v2076_v54 = vpop.f32.mrb[23].mxu1 }
 0x146   :  { %3440 = vst [vmem:[#allocation21_spill] sm:$0xff] %v2074_v49  ;;  %v1003_v60 = vadd.f32 %v1002_v59, %v2074_v49 }
 0x148   :  { %v1004_v61 = vadd.f32 %v2061_v34, %v1003_v60 }
 0x14a   :  { %v2081_v2 = vpop.f32.mrb[24].mxu0  ;;  %v2083_v7 = vpop.f32.mrb[24].mxu1  ;;  %v1005_v14 = vadd.f32 %v2070_v39, %v1004_v61 }
 0x14b   :  { %3441 = vst [vmem:[#allocation22_spill] sm:$0xff] %v2081_v2  ;;  %v2085_v8 = vpop.f32.mrb[25].mxu0  ;;  %v2087_v9 = vpop.f32.mrb[25].mxu1 }
 0x14c   :  { %3442 = vst [vmem:[#allocation23_spill] sm:$0xff] %v2085_v8  ;;  %v2090_v19 = vpop.f32.mrb[26].mxu0  ;;  %v2092_v20 = vpop.f32.mrb[26].mxu1  ;;  %v1006_v31 = vadd.f32 %v1005_v14, %v2085_v8 }
 0x14d   :  { %3443 = vst [vmem:[#allocation24_spill] sm:$0xff] %v2090_v19  ;;  %v2094_v21 = vpop.f32.mrb[27].mxu0  ;;  %v2096_v26 = vpop.f32.mrb[27].mxu1 }
 0x14e   :  { %3444 = vst [vmem:[#allocation25_spill] sm:$0xff] %v2094_v21  ;;  %v1007_v32 = vadd.f32 %v1006_v31, %v2094_v21 }
 0x150   :  { %v1008_v33 = vadd.f32 %v2081_v2, %v1007_v32 }
 0x152   :  { %v2101_v38 = vpop.f32.mrb[28].mxu0  ;;  %v2103_v59 = vpop.f32.mrb[28].mxu1  ;;  %v1009_v39 = vadd.f32 %v2090_v19, %v1008_v33 }
 0x153   :  { %v2105_v60 = vpop.f32.mrb[29].mxu0  ;;  %v2107_v61 = vpop.f32.mrb[29].mxu1 }
 0x154   :  { %v2110_v34 = vpop.f32.mrb[30].mxu0  ;;  %v2112_v49 = vpop.f32.mrb[30].mxu1  ;;  %v1010_v31 = vadd.f32 %v1009_v39, %v2105_v60 }
 0x155   :  { %v2114_v36 = vpop.f32.mrb[31].mxu0  ;;  %v776_v14 = vpop.f32.mrb[31].mxu1 }
 0x156   :  { %v1011_v32 = vadd.f32 %v1010_v31, %v2114_v36 }
 0x158   :  { %v1012_v2 = vadd.f32 %v2101_v38, %v1011_v32 }
 0x15a   :  { %v1013_v21 = vadd.f32 %v2110_v34, %v1012_v2 }
 0x15c   :  { %v1014_v8 = vadd.f32 %v1013_v21, %v1968_v43 }
 0x15e   :  { %v1015_v27 = vadd.f32 %v1014_v8, %v1976_v47 }
 0x160   :  { %v1016_v33 = vadd.f32 %v1964_v41, %v1015_v27 }
 0x162   :  { %v1017_v19 = vadd.f32 %v1972_v45, %v1016_v33 }
 0x164   :  { %v1018_v22 = vadd.f32 %v1017_v19, %v1987_v53 }
 0x166   :  { %v1019_v29 = vadd.f32 %v1018_v22, %v1996_v58 }
 0x168   :  { %v1020_v39 = vadd.f32 %v1983_v51, %v1019_v29 }
 0x16a   :  { %v1021_v31 = vadd.f32 %v1992_v56, %v1020_v39 }
 0x16c   :  { %v1022_v32 = vadd.f32 %v1021_v31, %v2007_v1 }
 0x16e   :  { %v1023_v2 = vadd.f32 %v1022_v32, %v2016_v6 }
 0x170   :  { %v1024_v21 = vadd.f32 %v2003_v63, %v1023_v2 }
 0x172   :  { %v1025_v8 = vadd.f32 %v2012_v4, %v1024_v21 }
 0x174   :  { %v1026_v27 = vadd.f32 %v1025_v8, %v2027_v13 }
 0x176   :  { %v1027_v33 = vadd.f32 %v1026_v27, %v2036_v18 }
 0x178   :  { %v1028_v19 = vadd.f32 %v2023_v11, %v1027_v33 }
 0x17a   :  { %v1029_v22 = vadd.f32 %v2032_v16, %v1028_v19 }
 0x17c   :  { %v1030_v29 = vadd.f32 %v1029_v22, %v2047_v25 }
 0x17e   :  { %v1031_v39 = vadd.f32 %v1030_v29, %v2056_v30 }
 0x180   :  { %v1032_v31 = vadd.f32 %v2043_v23, %v1031_v39 }
 0x182   :  { %v1033_v32 = vadd.f32 %v2052_v28, %v1032_v31 }
 0x184   :  { %v1034_v2 = vadd.f32 %v1033_v32, %v2067_v37 }
 0x186   :  { %v1035_v21 = vadd.f32 %v1034_v2, %v2076_v54 }
 0x188   :  { %v1036_v8 = vadd.f32 %v2063_v35, %v1035_v21 }
 0x18a   :  { %v1037_v27 = vadd.f32 %v2072_v48, %v1036_v8 }
 0x18c   :  { %v1038_v33 = vadd.f32 %v1037_v27, %v2087_v9 }
 0x18e   :  { %v1039_v19 = vadd.f32 %v1038_v33, %v2096_v26 }
 0x190   :  { %v1040_v22 = vadd.f32 %v2083_v7, %v1039_v19 }
 0x192   :  { %v1041_v29 = vadd.f32 %v2092_v20, %v1040_v22 }
 0x194   :  { %v1042_v39 = vadd.f32 %v1041_v29, %v2107_v61 }
 0x196   :  { %v1043_v13 = vadd.f32 %v1042_v39, %v776_v14 }
 0x198   :  { %v1044_v31 = vadd.f32 %v2103_v59, %v1043_v13 }
 0x19a   :  { %v1045_v32 = vadd.f32 %v2112_v49, %v1044_v31 }
 0x19c   :  { %v1046_v2 = vrot.slane %v1045_v32, 4 }
 0x19e   :  { %v1047_v4 = vadd.f32 %v1046_v2, %v1045_v32 }
 0x1a0   :  { %v1048_v21 = vrot.slane %v1047_v4, 2 }
 0x1a2   :  { %v1049_v63 = vadd.f32 %v1048_v21, %v1047_v4 }
 0x1a4   :  { %v1050_v8 = vrot.slane %v1049_v63, 1 }
 0x1a6   :  { %v1051_v6 = vadd.f32 %v1050_v8, %v1049_v63 }
 0x1a8   :  { %v2151_v27 = vmul.f32 0.001953125, %v1051_v6 }
 0x1aa   :  { %v2155_v33 = vsub.f32 %v2036_v18, %v2151_v27  ;;  %v2159_v19 = vsub.f32 %v2023_v11, %v2151_v27  ;;  %v2163_v13 = vsub.f32 %v2032_v16, %v2151_v27  ;;  %v2167_v22 = vsub.f32 %v2047_v25, %v2151_v27 }
 0x1ab   :  { %v2171_v63 = vsub.f32 %v2056_v30, %v2151_v27  ;;  %v2175_v4 = vsub.f32 %v2043_v23, %v2151_v27  ;;  %v2179_v6 = vsub.f32 %v2052_v28, %v2151_v27  ;;  %v2183_v11 = vsub.f32 %v2067_v37, %v2151_v27 }
 0x1ac   :  { %v2187_v16 = vsub.f32 %v2076_v54, %v2151_v27  ;;  %v2191_v18 = vsub.f32 %v2063_v35, %v2151_v27  ;;  %v2195_v23 = vsub.f32 %v2072_v48, %v2151_v27  ;;  %v2199_v25 = vsub.f32 %v2087_v9, %v2151_v27 }
 0x1ad   :  { %v2203_v28 = vsub.f32 %v2096_v26, %v2151_v27  ;;  %v2207_v30 = vsub.f32 %v2083_v7, %v2151_v27  ;;  %v2211_v35 = vsub.f32 %v2092_v20, %v2151_v27  ;;  %v2215_v37 = vsub.f32 %v2107_v61, %v2151_v27 }
 0x1ae   :  { %3445 = vst [vmem:[#allocation26_spill] sm:$0xff] %v2199_v25  ;;  %v2218_v48 = vsub.f32 %v776_v14, %v2151_v27  ;;  %v2222_v54 = vsub.f32 %v2103_v59, %v2151_v27  ;;  %v2226_v9 = vsub.f32 %v2112_v49, %v2151_v27  ;;  %v2230_v7 = vsub.f32 %v1966_v42, %v2151_v27 }
 0x1af   :  { %3446 = vst [vmem:[#allocation27_spill] sm:$0xff] %v2203_v28  ;;  %3447 = vst [vmem:[#allocation28_spill] sm:$0xff] %v2207_v30  ;;  %v2234_v20 = vsub.f32 %v1974_v46, %v2151_v27  ;;  %v2238_v26 = vsub.f32 %v1962_v40, %v2151_v27  ;;  %v2246_v49 = vsub.f32 %v1970_v44, %v2151_v27 }
 0x1b0   :  { %3448 = vst [vmem:[#allocation29_spill] sm:$0xff] %v2211_v35  ;;  %3449 = vst [vmem:[#allocation30_spill] sm:$0xff] %v2215_v37  ;;  %v1118_v59 = vmul.f32 %v2230_v7, %v2230_v7  ;;  %v2250_v42 = vsub.f32 %v1985_v52, %v2151_v27  ;;  %v2256_v40 = vsub.f32 %v1994_v57, %v2151_v27 }
 0x1b1   :  { %v1119_v61 = vmul.f32 %v2234_v20, %v2234_v20  ;;  %v1120_v46 = vmul.f32 %v2238_v26, %v2238_v26  ;;  %v1121_v29 = vmul.f32 %v2246_v49, %v2246_v49  ;;  %v2262_v44 = vsub.f32 %v1981_v50, %v2151_v27 }
 0x1b2   :  { %v1122_v52 = vmul.f32 %v2250_v42, %v2250_v42  ;;  %v2268_v32 = vsub.f32 %v1990_v55, %v2151_v27  ;;  %v1123_v57 = vmul.f32 %v2256_v40, %v2256_v40  ;;  %v2274_v21 = vsub.f32 %v2005_v0, %v2151_v27 }
 0x1b3   :  { %v1182_v14 = vadd.f32 %v1119_v61, %v1118_v59  ;;  %v1124_v50 = vmul.f32 %v2262_v44, %v2262_v44  ;;  %v2280_v59 = vsub.f32 %v2014_v5, %v2151_v27 }
 0x1b4   :  { %v1125_v55 = vmul.f32 %v2268_v32, %v2268_v32  ;;  %v1126_v0 = vmul.f32 %v2274_v21, %v2274_v21 }
 0x1b5   :  { %v1183_v39 = vadd.f32 %v1182_v14, %v1120_v46  ;;  %v2286_v46 = vsub.f32 %v2001_v62, %v2151_v27  ;;  %v1127_v5 = vmul.f32 %v2280_v59, %v2280_v59 }
 0x1b7   :  { %v1184_v31 = vadd.f32 %v1183_v39, %v1121_v29  ;;  %v2292_v29 = vsub.f32 %v2010_v3, %v2151_v27  ;;  %v1128_v62 = vmul.f32 %v2286_v46, %v2286_v46 }
 0x1b9   :  { %v1185_v2 = vadd.f32 %v1184_v31, %v1122_v52  ;;  %v2298_v52 = vsub.f32 %v2025_v12, %v2151_v27  ;;  %v1129_v3 = vmul.f32 %v2292_v29, %v2292_v29 }
 0x1bb   :  { %v1186_v8 = vadd.f32 %v1185_v2, %v1123_v57  ;;  %v2304_v57 = vsub.f32 %v2034_v17, %v2151_v27  ;;  %v1130_v12 = vmul.f32 %v2298_v52, %v2298_v52 }
 0x1bd   :  { %v1187_v61 = vadd.f32 %v1186_v8, %v1124_v50  ;;  %v2310_v50 = vsub.f32 %v2021_v10, %v2151_v27  ;;  %v1131_v17 = vmul.f32 %v2304_v57, %v2304_v57 }
 0x1bf   :  { %v1188_v14 = vadd.f32 %v1187_v61, %v1125_v55  ;;  %v2316_v55 = vsub.f32 %v2030_v15, %v2151_v27  ;;  %v1132_v10 = vmul.f32 %v2310_v50, %v2310_v50 }
 0x1c1   :  { %v1189_v39 = vadd.f32 %v1188_v14, %v1126_v0  ;;  %3450 = vst [vmem:[#allocation31_spill] sm:$0xff] %v2316_v55  ;;  %v2322_v0 = vsub.f32 %v2045_v24, %v2151_v27  ;;  %v1133_v15 = vmul.f32 %v2316_v55, %v2316_v55 }
 0x1c3   :  { %v1190_v31 = vadd.f32 %v1189_v39, %v1127_v5  ;;  %3451 = vst [vmem:[#allocation32_spill] sm:$0xff] %v2322_v0  ;;  %v3452_v5 = vld [vmem:[#allocation17_spill] sm:$0xff]  ;;  %v1134_v24 = vmul.f32 %v2322_v0, %v2322_v0 }
 0x1c4   :  { %v2328_v39 = vsub.f32 %v3452_v5, %v2151_v27  ;;  %v3458_v5 = vld [vmem:[#allocation19_spill] sm:$0xff] }
 0x1c5   :  { %v1191_v2 = vadd.f32 %v1190_v31, %v1128_v62  ;;  %v3454_v31 = vld [vmem:[#allocation15_spill] sm:$0xff]  ;;  %v2346_v55 = vsub.f32 %v3458_v5, %v2151_v27  ;;  %v3464_v5 = vld [vmem:[#allocation20_spill] sm:$0xff] }
 0x1c6   :  { %3453 = vst [vmem:[#allocation17_spill] sm:$0xff] %v2328_v39 }
 0x1c7   :  { %v1192_v8 = vadd.f32 %v1191_v2, %v1129_v3  ;;  %v2334_v3 = vsub.f32 %v3454_v31, %v2151_v27  ;;  %3459 = vst [vmem:[#allocation19_spill] sm:$0xff] %v2346_v55  ;;  %v3460_v31 = vld [vmem:[#allocation21_spill] sm:$0xff] }
 0x1c8   :  { %v2352_v0 = vsub.f32 %v3460_v31, %v2151_v27  ;;  %v3465_v31 = vld [vmem:[#allocation23_spill] sm:$0xff] }
 0x1c9   :  { %v1193_v61 = vadd.f32 %v1192_v8, %v1130_v12  ;;  %3455 = vst [vmem:[#allocation15_spill] sm:$0xff] %v2334_v3  ;;  %v3456_v12 = vld [vmem:[#allocation16_spill] sm:$0xff] }
 0x1ca   :  { %v2340_v8 = vsub.f32 %v3456_v12, %v2151_v27  ;;  %3461 = vst [vmem:[#allocation21_spill] sm:$0xff] %v2352_v0  ;;  %v3462_v12 = vld [vmem:[#allocation18_spill] sm:$0xff] }
 0x1cb   :  { %v1194_v14 = vadd.f32 %v1193_v61, %v1131_v17  ;;  %v1135_v17 = vmul.f32 %v2328_v39, %v2328_v39  ;;  %v2358_v39 = vsub.f32 %v3462_v12, %v2151_v27  ;;  %v3466_v12 = vld [vmem:[#allocation25_spill] sm:$0xff] }
 0x1cc   :  { %3457 = vst [vmem:[#allocation16_spill] sm:$0xff] %v2340_v8 }
 0x1cd   :  { %v1195_v62 = vadd.f32 %v1194_v14, %v1132_v10  ;;  %v1136_v10 = vmul.f32 %v2334_v3, %v2334_v3  ;;  %3463 = vst [vmem:[#allocation18_spill] sm:$0xff] %v2358_v39  ;;  %v2364_v3 = vsub.f32 %v3464_v5, %v2151_v27  ;;  %v3467_v5 = vld [vmem:[#allocation22_spill] sm:$0xff] }
 0x1cf   :  { %v1196_v2 = vadd.f32 %v1195_v62, %v1133_v15  ;;  %v1137_v15 = vmul.f32 %v2340_v8, %v2340_v8  ;;  %v2370_v8 = vsub.f32 %v3465_v31, %v2151_v27  ;;  %v3468_v31 = vld [vmem:[#allocation24_spill] sm:$0xff] }
 0x1d1   :  { %v1197_v61 = vadd.f32 %v1196_v2, %v1134_v24  ;;  %v1138_v24 = vmul.f32 %v2346_v55, %v2346_v55  ;;  %v2376_v55 = vsub.f32 %v3466_v12, %v2151_v27  ;;  %v2394_v12 = vsub.f32 %v2105_v60, %v2151_v27 }
 0x1d3   :  { %v1198_v14 = vadd.f32 %v1197_v61, %v1135_v17  ;;  %v1139_v17 = vmul.f32 %v2352_v0, %v2352_v0  ;;  %v2382_v0 = vsub.f32 %v3467_v5, %v2151_v27  ;;  %v2400_v5 = vsub.f32 %v2114_v36, %v2151_v27 }
 0x1d4   :  { %v1146_v60 = vmul.f32 %v2394_v12, %v2394_v12 }
 0x1d5   :  { %v1199_v62 = vadd.f32 %v1198_v14, %v1136_v10  ;;  %v1140_v10 = vmul.f32 %v2358_v39, %v2358_v39  ;;  %v2388_v39 = vsub.f32 %v3468_v31, %v2151_v27  ;;  %v2406_v31 = vsub.f32 %v2101_v38, %v2151_v27 }
 0x1d6   :  { %v1147_v36 = vmul.f32 %v2400_v5, %v2400_v5 }
 0x1d7   :  { %v1200_v2 = vadd.f32 %v1199_v62, %v1137_v15  ;;  %v1141_v15 = vmul.f32 %v2364_v3, %v2364_v3  ;;  %v1148_v38 = vmul.f32 %v2406_v31, %v2406_v31 }
 0x1d9   :  { %v1201_v61 = vadd.f32 %v1200_v2, %v1138_v24  ;;  %v1142_v24 = vmul.f32 %v2370_v8, %v2370_v8 }
 0x1db   :  { %v1202_v14 = vadd.f32 %v1201_v61, %v1139_v17  ;;  %v1143_v17 = vmul.f32 %v2376_v55, %v2376_v55 }
 0x1dd   :  { %v1203_v62 = vadd.f32 %v1202_v14, %v1140_v10  ;;  %v1144_v10 = vmul.f32 %v2382_v0, %v2382_v0 }
 0x1df   :  { %v1204_v2 = vadd.f32 %v1203_v62, %v1141_v15  ;;  %v1145_v15 = vmul.f32 %v2388_v39, %v2388_v39 }
 0x1e1   :  { %v1205_v61 = vadd.f32 %v1204_v2, %v1142_v24  ;;  %v2412_v2 = vsub.f32 %v2110_v34, %v2151_v27 }
 0x1e3   :  { %v1206_v14 = vadd.f32 %v1205_v61, %v1143_v17  ;;  %v2418_v61 = vsub.f32 %v1968_v43, %v2151_v27  ;;  %v1149_v34 = vmul.f32 %v2412_v2, %v2412_v2 }
 0x1e5   :  { %v1207_v62 = vadd.f32 %v1206_v14, %v1144_v10  ;;  %v2424_v14 = vsub.f32 %v1976_v47, %v2151_v27  ;;  %v1150_v43 = vmul.f32 %v2418_v61, %v2418_v61 }
 0x1e7   :  { %v1208_v24 = vadd.f32 %v1207_v62, %v1145_v15  ;;  %v2430_v62 = vsub.f32 %v1964_v41, %v2151_v27  ;;  %v1151_v47 = vmul.f32 %v2424_v14, %v2424_v14 }
 0x1e9   :  { %v1209_v17 = vadd.f32 %v1208_v24, %v1146_v60  ;;  %v2436_v24 = vsub.f32 %v1972_v45, %v2151_v27  ;;  %v1152_v41 = vmul.f32 %v2430_v62, %v2430_v62 }
 0x1eb   :  { %v1210_v10 = vadd.f32 %v1209_v17, %v1147_v36  ;;  %v2442_v17 = vsub.f32 %v1987_v53, %v2151_v27  ;;  %v1153_v45 = vmul.f32 %v2436_v24, %v2436_v24 }
 0x1ed   :  { %v1211_v15 = vadd.f32 %v1210_v10, %v1148_v38  ;;  %3469 = vst [vmem:[#allocation20_spill] sm:$0xff] %v2442_v17  ;;  %v2448_v10 = vsub.f32 %v1996_v58, %v2151_v27  ;;  %v1154_v53 = vmul.f32 %v2442_v17, %v2442_v17 }
 0x1ef   :  { %v1212_v60 = vadd.f32 %v1211_v15, %v1149_v34  ;;  %3470 = vst [vmem:[#allocation23_spill] sm:$0xff] %v2448_v10  ;;  %v2454_v15 = vsub.f32 %v1983_v51, %v2151_v27  ;;  %v1155_v58 = vmul.f32 %v2448_v10, %v2448_v10 }
 0x1f1   :  { %v1213_v36 = vadd.f32 %v1212_v60, %v1150_v43  ;;  %3471 = vst [vmem:[#allocation25_spill] sm:$0xff] %v2454_v15  ;;  %v2460_v60 = vsub.f32 %v1992_v56, %v2151_v27  ;;  %v1156_v51 = vmul.f32 %v2454_v15, %v2454_v15 }
 0x1f3   :  { %v1214_v38 = vadd.f32 %v1213_v36, %v1151_v47  ;;  %3472 = vst [vmem:[#allocation22_spill] sm:$0xff] %v2460_v60  ;;  %v2466_v36 = vsub.f32 %v2007_v1, %v2151_v27  ;;  %v1157_v56 = vmul.f32 %v2460_v60, %v2460_v60 }
 0x1f5   :  { %v1215_v34 = vadd.f32 %v1214_v38, %v1152_v41  ;;  %v3473_v38 = vld [vmem:[#allocation13_spill] sm:$0xff]  ;;  %v1158_v1 = vmul.f32 %v2466_v36, %v2466_v36 }
 0x1f6   :  { %v2472_v17 = vsub.f32 %v3473_v38, %v2151_v27  ;;  %v3477_v38 = vld [vmem:[#allocation14_spill] sm:$0xff] }
 0x1f7   :  { %v1216_v43 = vadd.f32 %v1215_v34, %v1153_v45  ;;  %v3475_v34 = vld [vmem:[#allocation11_spill] sm:$0xff]  ;;  %v2490_v60 = vsub.f32 %v3477_v38, %v2151_v27  ;;  %v1165_v38 = vmul.f32 %v2163_v13, %v2163_v13 }
 0x1f8   :  { %3474 = vst [vmem:[#allocation24_spill] sm:$0xff] %v2472_v17  ;;  %v2478_v10 = vsub.f32 %v3475_v34, %v2151_v27 }
 0x1f9   :  { %v1217_v47 = vadd.f32 %v1216_v43, %v1154_v53  ;;  %v3476_v43 = vld [vmem:[#allocation12_spill] sm:$0xff] }
 0x1fa   :  { %v2484_v15 = vsub.f32 %v3476_v43, %v2151_v27  ;;  %v1164_v27 = vmul.f32 %v2159_v19, %v2159_v19 }
 0x1fb   :  { %v1218_v41 = vadd.f32 %v1217_v47, %v1155_v58  ;;  %v1159_v58 = vmul.f32 %v2472_v17, %v2472_v17  ;;  %v1163_v17 = vmul.f32 %v2155_v33, %v2155_v33 }
 0x1fc   :  { %v1161_v34 = vmul.f32 %v2484_v15, %v2484_v15 }
 0x1fd   :  { %v1219_v45 = vadd.f32 %v1218_v41, %v1156_v51  ;;  %v1160_v51 = vmul.f32 %v2478_v10, %v2478_v10 }
 0x1ff   :  { %v1220_v53 = vadd.f32 %v1219_v45, %v1157_v56  ;;  %v1162_v45 = vmul.f32 %v2490_v60, %v2490_v60 }
 0x201   :  { %v1221_v47 = vadd.f32 %v1220_v53, %v1158_v1 }
 0x203   :  { %v1222_v41 = vadd.f32 %v1221_v47, %v1159_v58  ;;  %v1166_v47 = vmul.f32 %v2167_v22, %v2167_v22 }
 0x205   :  { %v1223_v56 = vadd.f32 %v1222_v41, %v1160_v51  ;;  %v1167_v41 = vmul.f32 %v2171_v63, %v2171_v63 }
 0x207   :  { %v1224_v43 = vadd.f32 %v1223_v56, %v1161_v34  ;;  %v1168_v56 = vmul.f32 %v2175_v4, %v2175_v4 }
 0x209   :  { %v1225_v1 = vadd.f32 %v1224_v43, %v1162_v45  ;;  %v1169_v43 = vmul.f32 %v2179_v6, %v2179_v6 }
 0x20b   :  { %v1226_v53 = vadd.f32 %v1225_v1, %v1163_v17  ;;  %v1170_v1 = vmul.f32 %v2183_v11, %v2183_v11 }
 0x20d   :  { %v1227_v58 = vadd.f32 %v1226_v53, %v1164_v27  ;;  %v1171_v53 = vmul.f32 %v2187_v16, %v2187_v16 }
 0x20f   :  { %v1228_v51 = vadd.f32 %v1227_v58, %v1165_v38  ;;  %v1172_v58 = vmul.f32 %v2191_v18, %v2191_v18 }
 0x211   :  { %v1229_v34 = vadd.f32 %v1228_v51, %v1166_v47  ;;  %v1173_v51 = vmul.f32 %v2195_v23, %v2195_v23 }
 0x213   :  { %v1230_v45 = vadd.f32 %v1229_v34, %v1167_v41  ;;  %v1174_v34 = vmul.f32 %v2199_v25, %v2199_v25 }
 0x215   :  { %v1231_v17 = vadd.f32 %v1230_v45, %v1168_v56  ;;  %v1175_v45 = vmul.f32 %v2203_v28, %v2203_v28 }
 0x217   :  { %v1232_v27 = vadd.f32 %v1231_v17, %v1169_v43  ;;  %v1176_v17 = vmul.f32 %v2207_v30, %v2207_v30 }
 0x219   :  { %v1233_v38 = vadd.f32 %v1232_v27, %v1170_v1  ;;  %v1177_v27 = vmul.f32 %v2211_v35, %v2211_v35 }
 0x21b   :  { %v1234_v47 = vadd.f32 %v1233_v38, %v1171_v53  ;;  %v1178_v38 = vmul.f32 %v2215_v37, %v2215_v37 }
 0x21d   :  { %v1235_v41 = vadd.f32 %v1234_v47, %v1172_v58  ;;  %v1179_v47 = vmul.f32 %v2218_v48, %v2218_v48 }
 0x21f   :  { %v1236_v56 = vadd.f32 %v1235_v41, %v1173_v51  ;;  %v1180_v41 = vmul.f32 %v2222_v54, %v2222_v54 }
 0x221   :  { %v1237_v43 = vadd.f32 %v1236_v56, %v1174_v34  ;;  %v1181_v56 = vmul.f32 %v2226_v9, %v2226_v9 }
 0x223   :  { %v1238_v1 = vadd.f32 %v1237_v43, %v1175_v45 }
 0x225   :  { %v1239_v53 = vadd.f32 %v1238_v1, %v1176_v17 }
 0x227   :  { %v1240_v58 = vadd.f32 %v1239_v53, %v1177_v27 }
 0x229   :  { %v1241_v51 = vadd.f32 %v1240_v58, %v1178_v38  ;;  %v2541_v38 = vld [vmem:[%s3392_s2] ss:$0 sm:$0xff]  ;;  %s1910_s2 = smov [#allocation7]  }
 0x22b   :  { %v1242_v34 = vadd.f32 %v1241_v51, %v1179_v47 }
 0x22d   :  { %v1243_v45 = vadd.f32 %v1242_v34, %v1180_v41 }
 0x22f   :  { %v1244_v43 = vadd.f32 %v1243_v45, %v1181_v56 }
 0x231   :  { %v1245_v30 = vrot.slane %v1244_v43, 4 }
 0x233   :  { %v1246_v35 = vadd.f32 %v1245_v30, %v1244_v43 }
 0x235   :  { %v1247_v17 = vrot.slane %v1246_v35, 2 }
 0x237   :  { %v1248_v1 = vadd.f32 %v1247_v17, %v1246_v35  ;;  %v3483_v17 = vld [vmem:[#allocation16_spill] sm:$0xff] }
 0x239   :  { %v1249_v28 = vrot.slane %v1248_v1, 1 }
 0x23b   :  { %v1250_v37 = vadd.f32 %v1249_v28, %v1248_v1  ;;  %v3484_v1 = vld [vmem:[#allocation19_spill] sm:$0xff] }
 0x23d   :  { %v1251_v27 = vmul.f32 0.001953125, %v1250_v37  ;;  %v2560_v37 = vld [vmem:[%s3393_s3] ss:$0 sm:$0xff]  ;;  %s1593_s3 = sshll.u32 %s1910_s2, 4  ;;  %s3367_s3 = int_to_ptr.vmem [resolvable:$true] %s1593_s3 }
 0x23e   :  { %3478 = vst [vmem:[#allocation13_spill] sm:$0xff] %v2560_v37  ;;  %s1878_s17 = scalar_lea.vmem %s3367_s3, 8192  ;;  %p1883_p3 = scmp.lt.s32.totalorder %s3367_s3, %s3367_s3 }
 0x23f   :  { %v1252_v53 = vadd.f32 1e-05, %v1251_v27  ;;  %p1879_p2 = scmp.ne.s32.totalorder %s3367_s3, %s1878_s17  ;;  %p1884_p4 = scmp.lt.s32.totalorder %s1878_s17, %s1878_s17 }
 0x241   :  { %1832 = vrsqrt.f32 %v1252_v53  ;;  %p1885_p5 = por %p1884_p4, %p1883_p3 }
 0x243   :  { %p1886_p6 = pnand %p1885_p5, %p1879_p2 }
 0x24b   :  { %v2536_v25 = vpop.eup %1832 }
 0x24c   :  { %v1315_v58 = vmul.f32 %v2536_v25, %v2218_v48  ;;  %v2547_v30 = vmul.f32 %v2536_v25, %v2230_v7  ;;  %v2551_v28 = vmul.f32 %v2536_v25, %v2234_v20  ;;  %v2555_v35 = vmul.f32 %v2536_v25, %v2238_v26 }
 0x24d   :  { %v2564_v48 = vmul.f32 %v2536_v25, %v2246_v49  ;;  %v2568_v7 = vmul.f32 %v2536_v25, %v2250_v42  ;;  %v2572_v20 = vmul.f32 %v2536_v25, %v2256_v40  ;;  %v2576_v26 = vmul.f32 %v2536_v25, %v2262_v44 }
 0x24e   :  { %v1386_v47 = vmul.f32 %v2541_v38, %v1315_v58  ;;  %v2581_v51 = vmul.f32 %v2536_v25, %v2268_v32  ;;  %v2585_v49 = vmul.f32 %v2536_v25, %v2274_v21  ;;  %v2589_v42 = vmul.f32 %v2536_v25, %v2280_v59  ;;  %v3485_v58 = vld [vmem:[#allocation21_spill] sm:$0xff] }
 0x24f   :  { %v2593_v40 = vmul.f32 %v2536_v25, %v2286_v46  ;;  %v2597_v44 = vmul.f32 %v2536_v25, %v2292_v29  ;;  %v2601_v32 = vmul.f32 %v2536_v25, %v2298_v52  ;;  %v2605_v21 = vmul.f32 %v2536_v25, %v2304_v57  ;;  %v3479_v46 = vld [vmem:[#allocation31_spill] sm:$0xff]  ;;  %v3480_v29 = vld [vmem:[#allocation32_spill] sm:$0xff]  ;;  %v3481_v52 = vld [vmem:[#allocation17_spill] sm:$0xff] }
 0x250   :  { %v1457_v41 = vadd.f32 %v2560_v37, %v1386_v47  ;;  %v2610_v59 = vmul.f32 %v2536_v25, %v2310_v50  ;;  %v2614_v34 = vmul.f32 %v2536_v25, %v3479_v46  ;;  %v2618_v56 = vmul.f32 %v2536_v25, %v3480_v29  ;;  %v3482_v57 = vld [vmem:[#allocation15_spill] sm:$0xff]  ;;  %v3486_v46 = vld [vmem:[#allocation18_spill] sm:$0xff] }
 0x251   :  { %v2622_v45 = vmul.f32 %v2536_v25, %v3481_v52  ;;  %v2626_v43 = vmul.f32 %v2536_v25, %v3482_v57  ;;  %v2630_v50 = vmul.f32 %v2536_v25, %v3483_v17  ;;  %v2634_v27 = vmul.f32 %v2536_v25, %v3484_v1  ;;  %v3491_v37 = vld [vmem:[#allocation22_spill] sm:$0xff] }
 0x252   :  { %v1521_v53 = vmax.f32 %v1457_v41, 0.0  ;;  %v2638_v47 = vmul.f32 %v2536_v25, %v3485_v58  ;;  %v2642_v29 = vmul.f32 %v2536_v25, %v3486_v46  ;;  %v2646_v52 = vmul.f32 %v2536_v25, %v2364_v3  ;;  %v3489_v58 = vld [vmem:[#allocation23_spill] sm:$0xff]  ;;  %v3490_v46 = vld [vmem:[#allocation25_spill] sm:$0xff] }
 0x253   :  { %v2650_v57 = vmul.f32 %v2536_v25, %v2370_v8  ;;  %v2654_v17 = vmul.f32 %v2536_v25, %v2376_v55  ;;  %v2658_v41 = vmul.f32 %v2536_v25, %v2382_v0  ;;  %v2662_v1 = vmul.f32 %v2536_v25, %v2388_v39 }
 0x254   :  { %1585 = vst [vmem:[#allocation7 + $0x1e8] sm:$0xff] %v1521_v53  ;;  %v2666_v3 = vmul.f32 %v2536_v25, %v2394_v12  ;;  %v2670_v8 = vmul.f32 %v2536_v25, %v2400_v5  ;;  %v2674_v55 = vmul.f32 %v2536_v25, %v2406_v31  ;;  %v2678_v0 = vmul.f32 %v2536_v25, %v2412_v2  ;;  %v3488_v53 = vld [vmem:[#allocation20_spill] sm:$0xff] }
 0x255   :  { %v2682_v39 = vmul.f32 %v2536_v25, %v2418_v61  ;;  %v2686_v12 = vmul.f32 %v2536_v25, %v2424_v14  ;;  %v2690_v5 = vmul.f32 %v2536_v25, %v2430_v62  ;;  %v2694_v31 = vmul.f32 %v2536_v25, %v2436_v24 }
 0x256   :  { %v2698_v2 = vmul.f32 %v2536_v25, %v3488_v53  ;;  %v2702_v61 = vmul.f32 %v2536_v25, %v3489_v58  ;;  %v2706_v14 = vmul.f32 %v2536_v25, %v3490_v46  ;;  %v2710_v62 = vmul.f32 %v2536_v25, %v3491_v37 }
 0x257   :  { %3487 = vst [vmem:[#allocation11_spill] sm:$0xff] %v2694_v31  ;;  %v2714_v24 = vmul.f32 %v2536_v25, %v2466_v36  ;;  %v3492_v31 = vld [vmem:[#allocation24_spill] sm:$0xff]  ;;  %v2722_v58 = vmul.f32 %v2536_v25, %v2478_v10  ;;  %v2726_v46 = vmul.f32 %v2536_v25, %v2484_v15  ;;  %v2730_v37 = vmul.f32 %v2536_v25, %v2490_v60 }
 0x258   :  { %v2718_v53 = vmul.f32 %v2536_v25, %v3492_v31  ;;  %v2734_v36 = vmul.f32 %v2536_v25, %v2155_v33  ;;  %v2738_v31 = vmul.f32 %v2536_v25, %v2159_v19  ;;  %v2742_v10 = vmul.f32 %v2536_v25, %v2163_v13 }
 0x259   :  { %v2746_v15 = vmul.f32 %v2536_v25, %v2167_v22  ;;  %v2750_v60 = vmul.f32 %v2536_v25, %v2171_v63  ;;  %v2754_v33 = vmul.f32 %v2536_v25, %v2175_v4  ;;  %v2758_v19 = vmul.f32 %v2536_v25, %v2179_v6 }
 0x25a   :  { %v2762_v13 = vmul.f32 %v2536_v25, %v2183_v11  ;;  %v2766_v22 = vmul.f32 %v2536_v25, %v2187_v16  ;;  %v2770_v63 = vmul.f32 %v2536_v25, %v2191_v18  ;;  %v2774_v4 = vmul.f32 %v2536_v25, %v2195_v23 }
 0x25b   :  { %3493 = vst [vmem:[#allocation12_spill] sm:$0xff] %v2754_v33  ;;  %3494 = vst [vmem:[#allocation14_spill] sm:$0xff] %v2758_v19  ;;  %v3498_v33 = vld [vmem:[#allocation26_spill] sm:$0xff]  ;;  %v3499_v19 = vld [vmem:[#allocation27_spill] sm:$0xff] }
 0x25c   :  { %3495 = vst [vmem:[#allocation31_spill] sm:$0xff] %v2762_v13  ;;  %3496 = vst [vmem:[#allocation32_spill] sm:$0xff] %v2766_v22  ;;  %v2778_v6 = vmul.f32 %v2536_v25, %v3498_v33  ;;  %v2782_v11 = vmul.f32 %v2536_v25, %v3499_v19  ;;  %v3500_v13 = vld [vmem:[#allocation28_spill] sm:$0xff]  ;;  %v3501_v22 = vld [vmem:[#allocation29_spill] sm:$0xff]  ;;  %v2798_v33 = vmul.f32 %v2536_v25, %v2222_v54 }
 0x25d   :  { %3497 = vst [vmem:[#allocation17_spill] sm:$0xff] %v2770_v63  ;;  %v2786_v16 = vmul.f32 %v2536_v25, %v3500_v13  ;;  %v2790_v18 = vmul.f32 %v2536_v25, %v3501_v22  ;;  %v3502_v63 = vld [vmem:[#allocation30_spill] sm:$0xff]  ;;  %v2802_v19 = vmul.f32 %v2536_v25, %v2226_v9  ;;  %v2806_v13 = vmul.f32 %v2541_v38, %v2547_v30 }
 0x25e   :  { %v2794_v23 = vmul.f32 %v2536_v25, %v3502_v63  ;;  %v2810_v22 = vmul.f32 %v2541_v38, %v2551_v28  ;;  %v2814_v63 = vmul.f32 %v2541_v38, %v2555_v35  ;;  %v2818_v54 = vmul.f32 %v2541_v38, %v2564_v48 }
 0x25f   :  { %v2822_v25 = vmul.f32 %v2541_v38, %v2568_v7  ;;  %v2826_v9 = vmul.f32 %v2541_v38, %v2572_v20  ;;  %v2830_v30 = vmul.f32 %v2541_v38, %v2576_v26  ;;  %v2834_v28 = vmul.f32 %v2541_v38, %v2581_v51 }
 0x260   :  { %v2838_v35 = vmul.f32 %v2541_v38, %v2585_v49  ;;  %v2842_v48 = vmul.f32 %v2541_v38, %v2589_v42  ;;  %v2846_v7 = vmul.f32 %v2541_v38, %v2593_v40  ;;  %v2850_v20 = vmul.f32 %v2541_v38, %v2597_v44 }
 0x261   :  { %v2854_v26 = vmul.f32 %v2541_v38, %v2601_v32  ;;  %v2858_v51 = vmul.f32 %v2541_v38, %v2605_v21  ;;  %v2862_v49 = vmul.f32 %v2541_v38, %v2610_v59  ;;  %v2866_v42 = vmul.f32 %v2541_v38, %v2614_v34 }
 0x262   :  { %v2870_v40 = vmul.f32 %v2541_v38, %v2618_v56  ;;  %v2874_v44 = vmul.f32 %v2541_v38, %v2622_v45  ;;  %v2878_v32 = vmul.f32 %v2541_v38, %v2626_v43  ;;  %v2882_v21 = vmul.f32 %v2541_v38, %v2630_v50 }
 0x263   :  { %v2886_v59 = vmul.f32 %v2541_v38, %v2634_v27  ;;  %v2890_v34 = vmul.f32 %v2541_v38, %v2638_v47  ;;  %v2894_v56 = vmul.f32 %v2541_v38, %v2642_v29  ;;  %v2898_v45 = vmul.f32 %v2541_v38, %v2646_v52 }
 0x264   :  { %v2902_v43 = vmul.f32 %v2541_v38, %v2650_v57  ;;  %v2906_v50 = vmul.f32 %v2541_v38, %v2654_v17  ;;  %v2910_v27 = vmul.f32 %v2541_v38, %v2658_v41  ;;  %v2914_v47 = vmul.f32 %v2541_v38, %v2662_v1 }
 0x265   :  { %v2918_v29 = vmul.f32 %v2541_v38, %v2666_v3  ;;  %v2922_v52 = vmul.f32 %v2541_v38, %v2670_v8  ;;  %v2926_v57 = vmul.f32 %v2541_v38, %v2674_v55  ;;  %v2930_v17 = vmul.f32 %v2541_v38, %v2678_v0  ;;  %v3503_v8 = vld [vmem:[#allocation11_spill] sm:$0xff] }
 0x266   :  { %v2934_v41 = vmul.f32 %v2541_v38, %v2682_v39  ;;  %v2938_v1 = vmul.f32 %v2541_v38, %v2686_v12  ;;  %v2942_v3 = vmul.f32 %v2541_v38, %v2690_v5  ;;  %v2946_v55 = vmul.f32 %v2541_v38, %v3503_v8 }
 0x267   :  { %v2950_v0 = vmul.f32 %v2541_v38, %v2698_v2  ;;  %v2954_v39 = vmul.f32 %v2541_v38, %v2702_v61  ;;  %v2958_v12 = vmul.f32 %v2541_v38, %v2706_v14  ;;  %v2962_v5 = vmul.f32 %v2541_v38, %v2710_v62 }
 0x268   :  { %v2966_v8 = vmul.f32 %v2541_v38, %v2714_v24  ;;  %v2970_v2 = vmul.f32 %v2541_v38, %v2718_v53  ;;  %v2974_v61 = vmul.f32 %v2541_v38, %v2722_v58  ;;  %v2978_v14 = vmul.f32 %v2541_v38, %v2726_v46 }
 0x269   :  { %v2982_v62 = vmul.f32 %v2541_v38, %v2730_v37  ;;  %v2986_v24 = vmul.f32 %v2541_v38, %v2734_v36  ;;  %v2990_v53 = vmul.f32 %v2541_v38, %v2738_v31  ;;  %v2994_v58 = vmul.f32 %v2541_v38, %v2742_v10 }
 0x26a   :  { %v2998_v46 = vmul.f32 %v2541_v38, %v2746_v15  ;;  %v3002_v37 = vmul.f32 %v2541_v38, %v2750_v60 }
 0x26b   :  { %3504 = vst [vmem:[#allocation15_spill] sm:$0xff] %v2982_v62  ;;  %3505 = vst [vmem:[#allocation16_spill] sm:$0xff] %v2986_v24  ;;  %v3509_v62 = vld [vmem:[#allocation12_spill] sm:$0xff]  ;;  %v3510_v24 = vld [vmem:[#allocation14_spill] sm:$0xff] }
 0x26c   :  { %3506 = vst [vmem:[#allocation19_spill] sm:$0xff] %v2990_v53  ;;  %3507 = vst [vmem:[#allocation21_spill] sm:$0xff] %v2994_v58  ;;  %v3006_v36 = vmul.f32 %v2541_v38, %v3509_v62  ;;  %v3010_v31 = vmul.f32 %v2541_v38, %v3510_v24  ;;  %v3511_v53 = vld [vmem:[#allocation31_spill] sm:$0xff]  ;;  %v3512_v58 = vld [vmem:[#allocation32_spill] sm:$0xff]  ;;  %v3026_v62 = vmul.f32 %v2541_v38, %v2774_v4 }
 0x26d   :  { %3508 = vst [vmem:[#allocation18_spill] sm:$0xff] %v2998_v46  ;;  %v3014_v10 = vmul.f32 %v2541_v38, %v3511_v53  ;;  %v3018_v15 = vmul.f32 %v2541_v38, %v3512_v58  ;;  %v3513_v46 = vld [vmem:[#allocation17_spill] sm:$0xff]  ;;  %v3030_v24 = vmul.f32 %v2541_v38, %v2778_v6  ;;  %v3034_v53 = vmul.f32 %v2541_v38, %v2782_v11 }
 0x26e   :  { %v3022_v60 = vmul.f32 %v2541_v38, %v3513_v46  ;;  %v3038_v58 = vmul.f32 %v2541_v38, %v2786_v16  ;;  %v3042_v46 = vmul.f32 %v2541_v38, %v2790_v18  ;;  %v3046_v4 = vmul.f32 %v2541_v38, %v2794_v23 }
 0x26f   :  { %3514 = vst [vmem:[#allocation20_spill] sm:$0xff] %v3034_v53  ;;  %v3050_v6 = vmul.f32 %v2541_v38, %v2798_v33  ;;  %v3054_v11 = vmul.f32 %v2541_v38, %v2802_v19  ;;  %v3515_v53 = vld [vmem:[#allocation13_spill] sm:$0xff] }
 0x270   :  { %v3058_v16 = vadd.f32 %v3515_v53, %v2806_v13  ;;  %v3062_v18 = vadd.f32 %v3515_v53, %v2810_v22  ;;  %v3066_v23 = vadd.f32 %v3515_v53, %v2814_v63  ;;  %v3070_v33 = vadd.f32 %v3515_v53, %v2818_v54 }
 0x271   :  { %v3074_v38 = vadd.f32 %v3515_v53, %v2822_v25  ;;  %v3078_v19 = vadd.f32 %v3515_v53, %v2826_v9  ;;  %v3082_v13 = vadd.f32 %v3515_v53, %v2830_v30  ;;  %v3086_v22 = vadd.f32 %v3515_v53, %v2834_v28 }
 0x272   :  { %v3090_v63 = vadd.f32 %v3515_v53, %v2838_v35  ;;  %v3094_v54 = vadd.f32 %v3515_v53, %v2842_v48  ;;  %v3098_v25 = vadd.f32 %v3515_v53, %v2846_v7  ;;  %v3102_v9 = vadd.f32 %v3515_v53, %v2850_v20 }
 0x273   :  { %v3106_v30 = vadd.f32 %v3515_v53, %v2854_v26  ;;  %v3110_v28 = vadd.f32 %v3515_v53, %v2858_v51  ;;  %v3114_v35 = vadd.f32 %v3515_v53, %v2862_v49  ;;  %v3118_v48 = vadd.f32 %v3515_v53, %v2866_v42 }
 0x274   :  { %v3122_v7 = vadd.f32 %v3515_v53, %v2870_v40  ;;  %v3126_v20 = vadd.f32 %v3515_v53, %v2874_v44  ;;  %v3130_v26 = vadd.f32 %v3515_v53, %v2878_v32  ;;  %v3134_v51 = vadd.f32 %v3515_v53, %v2882_v21 }
 0x275   :  { %v3138_v49 = vadd.f32 %v3515_v53, %v2886_v59  ;;  %v3142_v42 = vadd.f32 %v3515_v53, %v2890_v34  ;;  %v3146_v40 = vadd.f32 %v3515_v53, %v2894_v56  ;;  %v3150_v44 = vadd.f32 %v3515_v53, %v2898_v45 }
 0x276   :  { %v3154_v32 = vadd.f32 %v3515_v53, %v2902_v43  ;;  %v3158_v21 = vadd.f32 %v3515_v53, %v2906_v50  ;;  %v3162_v59 = vadd.f32 %v3515_v53, %v2910_v27  ;;  %v3166_v34 = vadd.f32 %v3515_v53, %v2914_v47 }
 0x277   :  { %v3170_v56 = vadd.f32 %v3515_v53, %v2918_v29  ;;  %v3174_v45 = vadd.f32 %v3515_v53, %v2922_v52  ;;  %v3178_v43 = vadd.f32 %v3515_v53, %v2926_v57  ;;  %v3182_v50 = vadd.f32 %v3515_v53, %v2930_v17 }
 0x278   :  { %v3186_v27 = vadd.f32 %v3515_v53, %v2934_v41  ;;  %v3190_v47 = vadd.f32 %v3515_v53, %v2938_v1  ;;  %v3194_v29 = vadd.f32 %v3515_v53, %v2942_v3  ;;  %v3198_v52 = vadd.f32 %v3515_v53, %v2946_v55 }
 0x279   :  { %v3202_v57 = vadd.f32 %v3515_v53, %v2950_v0  ;;  %v3206_v17 = vadd.f32 %v3515_v53, %v2954_v39  ;;  %v3210_v41 = vadd.f32 %v3515_v53, %v2958_v12  ;;  %v3214_v1 = vadd.f32 %v3515_v53, %v2962_v5  ;;  %v3520_v12 = vld [vmem:[#allocation15_spill] sm:$0xff] }
 0x27a   :  { %v3218_v3 = vadd.f32 %v3515_v53, %v2966_v8  ;;  %v3222_v55 = vadd.f32 %v3515_v53, %v2970_v2  ;;  %v3226_v0 = vadd.f32 %v3515_v53, %v2974_v61  ;;  %v3230_v39 = vadd.f32 %v3515_v53, %v2978_v14 }
 0x27b   :  { %3516 = vst [vmem:[#allocation23_spill] sm:$0xff] %v3214_v1  ;;  %v3234_v5 = vadd.f32 %v3515_v53, %v3520_v12  ;;  %v3521_v1 = vld [vmem:[#allocation16_spill] sm:$0xff]  ;;  %v3254_v12 = vadd.f32 %v3515_v53, %v3002_v37  ;;  %v3274_v37 = vadd.f32 %v3515_v53, %v3022_v60  ;;  %v3294_v60 = vadd.f32 %v3515_v53, %v3042_v46 }
 0x27c   :  { %3517 = vst [vmem:[#allocation25_spill] sm:$0xff] %v3218_v3  ;;  %3518 = vst [vmem:[#allocation22_spill] sm:$0xff] %v3222_v55  ;;  %v3238_v8 = vadd.f32 %v3515_v53, %v3521_v1  ;;  %v3522_v3 = vld [vmem:[#allocation19_spill] sm:$0xff]  ;;  %v3523_v55 = vld [vmem:[#allocation21_spill] sm:$0xff]  ;;  %v3258_v1 = vadd.f32 %v3515_v53, %v3006_v36  ;;  %v3278_v36 = vadd.f32 %v3515_v53, %v3026_v62  ;;  %v1463_v46 = vmax.f32 %v3070_v33, 0.0 }
 0x27d   :  { %3519 = vst [vmem:[#allocation24_spill] sm:$0xff] %v3226_v0  ;;  %v3242_v2 = vadd.f32 %v3515_v53, %v3522_v3  ;;  %v3246_v61 = vadd.f32 %v3515_v53, %v3523_v55  ;;  %v3524_v0 = vld [vmem:[#allocation18_spill] sm:$0xff]  ;;  %v3262_v3 = vadd.f32 %v3515_v53, %v3010_v31  ;;  %v3266_v55 = vadd.f32 %v3515_v53, %v3014_v10 }
 0x27e   :  { %v3250_v14 = vadd.f32 %v3515_v53, %v3524_v0  ;;  %v3270_v0 = vadd.f32 %v3515_v53, %v3018_v15  ;;  %v3282_v31 = vadd.f32 %v3515_v53, %v3030_v24  ;;  %v3290_v15 = vadd.f32 %v3515_v53, %v3038_v58  ;;  %3529 = vst [vmem:[#allocation29_spill] sm:$0xff] %v3294_v60 }
 0x27f   :  { %3525 = vst [vmem:[#allocation26_spill] sm:$0xff] %v3262_v3  ;;  %v3526_v3 = vld [vmem:[#allocation20_spill] sm:$0xff]  ;;  %v3298_v62 = vadd.f32 %v3515_v53, %v3046_v4  ;;  %v3302_v24 = vadd.f32 %v3515_v53, %v3050_v6  ;;  %v1461_v58 = vmax.f32 %v3062_v18, 0.0  ;;  %v1464_v60 = vmax.f32 %v3074_v38, 0.0  ;;  %1527 = vst [vmem:[#allocation7 + $0x18] sm:$0xff] %v1463_v46 }
 0x280   :  { %v3286_v10 = vadd.f32 %v3515_v53, %v3526_v3  ;;  %3528 = vst [vmem:[#allocation28_spill] sm:$0xff] %v3290_v15  ;;  %v3306_v3 = vadd.f32 %v3515_v53, %v3054_v11  ;;  %v1462_v15 = vmax.f32 %v3066_v23, 0.0  ;;  %v1465_v4 = vmax.f32 %v3078_v19, 0.0 }
 0x281   :  { %3530 = vst [vmem:[#allocation30_spill] sm:$0xff] %v3298_v62  ;;  %3531 = vst [vmem:[#allocation11_spill] sm:$0xff] %v3302_v24  ;;  %v1466_v62 = vmax.f32 %v3082_v13, 0.0  ;;  %v1467_v6 = vmax.f32 %v3086_v22, 0.0  ;;  %v1468_v24 = vmax.f32 %v3090_v63, 0.0  ;;  %v1469_v53 = vmax.f32 %v3094_v54, 0.0 }
 0x282   :  { %3527 = vst [vmem:[#allocation27_spill] sm:$0xff] %v3286_v10  ;;  %v1460_v10 = vmax.f32 %v3058_v16, 0.0  ;;  %v1470_v11 = vmax.f32 %v3098_v25, 0.0  ;;  %1525 = vst [vmem:[#allocation7 + $0x8] sm:$0xff] %v1461_v58  ;;  %v1471_v16 = vmax.f32 %v3102_v9, 0.0  ;;  %v1472_v18 = vmax.f32 %v3106_v30, 0.0 }
 0x283   :  { %1526 = vst [vmem:[#allocation7 + $0x10] sm:$0xff] %v1462_v15  ;;  %v1473_v23 = vmax.f32 %v3110_v28, 0.0  ;;  %v1474_v33 = vmax.f32 %v3114_v35, 0.0  ;;  %1528 = vst [vmem:[#allocation7 + $0x20] sm:$0xff] %v1464_v60  ;;  %v1475_v38 = vmax.f32 %v3118_v48, 0.0  ;;  %v1476_v19 = vmax.f32 %v3122_v7, 0.0 }
 0x284   :  { %1524 = vst [vmem:[#allocation7] sm:$0xff] %v1460_v10  ;;  %1529 = vst [vmem:[#allocation7 + $0x28] sm:$0xff] %v1465_v4  ;;  %v1477_v13 = vmax.f32 %v3126_v20, 0.0  ;;  %v1478_v22 = vmax.f32 %v3130_v26, 0.0  ;;  %v1479_v63 = vmax.f32 %v3134_v51, 0.0  ;;  %v1480_v54 = vmax.f32 %v3138_v49, 0.0 }
 0x285   :  { %1530 = vst [vmem:[#allocation7 + $0x30] sm:$0xff] %v1466_v62  ;;  %1531 = vst [vmem:[#allocation7 + $0x38] sm:$0xff] %v1467_v6  ;;  %v1481_v25 = vmax.f32 %v3142_v42, 0.0  ;;  %v1482_v9 = vmax.f32 %v3146_v40, 0.0  ;;  %v1483_v30 = vmax.f32 %v3150_v44, 0.0  ;;  %v1484_v28 = vmax.f32 %v3154_v32, 0.0 }
 0x286   :  { %1532 = vst [vmem:[#allocation7 + $0x40] sm:$0xff] %v1468_v24  ;;  %1533 = vst [vmem:[#allocation7 + $0x48] sm:$0xff] %v1469_v53  ;;  %v1485_v35 = vmax.f32 %v3158_v21, 0.0  ;;  %v1486_v48 = vmax.f32 %v3162_v59, 0.0  ;;  %v1487_v7 = vmax.f32 %v3166_v34, 0.0  ;;  %v1488_v20 = vmax.f32 %v3170_v56, 0.0 }
 0x287   :  { %1534 = vst [vmem:[#allocation7 + $0x50] sm:$0xff] %v1470_v11  ;;  %1535 = vst [vmem:[#allocation7 + $0x58] sm:$0xff] %v1471_v16  ;;  %v1489_v26 = vmax.f32 %v3174_v45, 0.0  ;;  %v1490_v51 = vmax.f32 %v3178_v43, 0.0  ;;  %v1491_v49 = vmax.f32 %v3182_v50, 0.0  ;;  %v1492_v42 = vmax.f32 %v3186_v27, 0.0 }
 0x288   :  { %1536 = vst [vmem:[#allocation7 + $0x60] sm:$0xff] %v1472_v18  ;;  %1537 = vst [vmem:[#allocation7 + $0x68] sm:$0xff] %v1473_v23  ;;  %v1493_v40 = vmax.f32 %v3190_v47, 0.0  ;;  %v1494_v44 = vmax.f32 %v3194_v29, 0.0  ;;  %v1495_v32 = vmax.f32 %v3198_v52, 0.0  ;;  %v1496_v21 = vmax.f32 %v3202_v57, 0.0 }
 0x289   :  { %1538 = vst [vmem:[#allocation7 + $0x70] sm:$0xff] %v1474_v33  ;;  %1539 = vst [vmem:[#allocation7 + $0x78] sm:$0xff] %v1475_v38  ;;  %v1497_v59 = vmax.f32 %v3206_v17, 0.0  ;;  %v1498_v34 = vmax.f32 %v3210_v41, 0.0  ;;  %v3532_v56 = vld [vmem:[#allocation23_spill] sm:$0xff]  ;;  %v3533_v43 = vld [vmem:[#allocation25_spill] sm:$0xff] }
 0x28a   :  { %1540 = vst [vmem:[#allocation7 + $0x80] sm:$0xff] %v1476_v19  ;;  %1541 = vst [vmem:[#allocation7 + $0x88] sm:$0xff] %v1477_v13  ;;  %v1499_v45 = vmax.f32 %v3532_v56, 0.0  ;;  %v1500_v50 = vmax.f32 %v3533_v43, 0.0  ;;  %v3534_v27 = vld [vmem:[#allocation22_spill] sm:$0xff]  ;;  %v3535_v29 = vld [vmem:[#allocation24_spill] sm:$0xff] }
 0x28b   :  { %1542 = vst [vmem:[#allocation7 + $0x90] sm:$0xff] %v1478_v22  ;;  %1543 = vst [vmem:[#allocation7 + $0x98] sm:$0xff] %v1479_v63  ;;  %v1501_v47 = vmax.f32 %v3534_v27, 0.0  ;;  %v1502_v10 = vmax.f32 %v3535_v29, 0.0  ;;  %v1503_v52 = vmax.f32 %v3230_v39, 0.0  ;;  %v1504_v57 = vmax.f32 %v3234_v5, 0.0 }
 0x28c   :  { %1544 = vst [vmem:[#allocation7 + $0xa0] sm:$0xff] %v1480_v54  ;;  %1545 = vst [vmem:[#allocation7 + $0xa8] sm:$0xff] %v1481_v25  ;;  %v1505_v17 = vmax.f32 %v3238_v8, 0.0  ;;  %v1506_v41 = vmax.f32 %v3242_v2, 0.0  ;;  %v1507_v15 = vmax.f32 %v3246_v61, 0.0  ;;  %v1508_v60 = vmax.f32 %v3250_v14, 0.0 }
 0x28d   :  { %1546 = vst [vmem:[#allocation7 + $0xb0] sm:$0xff] %v1482_v9  ;;  %1547 = vst [vmem:[#allocation7 + $0xb8] sm:$0xff] %v1483_v30  ;;  %v1509_v62 = vmax.f32 %v3254_v12, 0.0  ;;  %v1510_v39 = vmax.f32 %v3258_v1, 0.0  ;;  %v3536_v5 = vld [vmem:[#allocation26_spill] sm:$0xff]  ;;  %v1512_v2 = vmax.f32 %v3266_v55, 0.0 }
 0x28e   :  { %1548 = vst [vmem:[#allocation7 + $0xc0] sm:$0xff] %v1484_v28  ;;  %1549 = vst [vmem:[#allocation7 + $0xc8] sm:$0xff] %v1485_v35  ;;  %v1511_v8 = vmax.f32 %v3536_v5, 0.0  ;;  %v1513_v24 = vmax.f32 %v3270_v0, 0.0  ;;  %v1514_v58 = vmax.f32 %v3274_v37, 0.0  ;;  %v1515_v61 = vmax.f32 %v3278_v36, 0.0 }
 0x28f   :  { %1550 = vst [vmem:[#allocation7 + $0xd0] sm:$0xff] %v1486_v48  ;;  %1551 = vst [vmem:[#allocation7 + $0xd8] sm:$0xff] %v1487_v7  ;;  %v1516_v14 = vmax.f32 %v3282_v31, 0.0  ;;  %v3537_v12 = vld [vmem:[#allocation27_spill] sm:$0xff]  ;;  %v3538_v46 = vld [vmem:[#allocation28_spill] sm:$0xff]  ;;  %v1523_v31 = vmax.f32 %v3306_v3, 0.0 }
 0x290   :  { %1552 = vst [vmem:[#allocation7 + $0xe0] sm:$0xff] %v1488_v20  ;;  %1553 = vst [vmem:[#allocation7 + $0xe8] sm:$0xff] %v1489_v26  ;;  %v1517_v1 = vmax.f32 %v3537_v12, 0.0  ;;  %v1518_v4 = vmax.f32 %v3538_v46, 0.0  ;;  %v3539_v55 = vld [vmem:[#allocation29_spill] sm:$0xff]  ;;  %v3540_v37 = vld [vmem:[#allocation30_spill] sm:$0xff] }
 0x291   :  { %1554 = vst [vmem:[#allocation7 + $0xf0] sm:$0xff] %v1490_v51  ;;  %1555 = vst [vmem:[#allocation7 + $0xf8] sm:$0xff] %v1491_v49  ;;  %v1519_v0 = vmax.f32 %v3539_v55, 0.0  ;;  %v1520_v6 = vmax.f32 %v3540_v37, 0.0  ;;  %v3541_v53 = vld [vmem:[#allocation11_spill] sm:$0xff] }
 0x292   :  { %1556 = vst [vmem:[#allocation7 + $0x100] sm:$0xff] %v1492_v42  ;;  %1557 = vst [vmem:[#allocation7 + $0x108] sm:$0xff] %v1493_v40  ;;  %v1522_v36 = vmax.f32 %v3541_v53, 0.0 }
 0x293   :  { %1558 = vst [vmem:[#allocation7 + $0x110] sm:$0xff] %v1494_v44  ;;  %1559 = vst [vmem:[#allocation7 + $0x118] sm:$0xff] %v1495_v32 }
 0x294   :  { %1560 = vst [vmem:[#allocation7 + $0x120] sm:$0xff] %v1496_v21  ;;  %1561 = vst [vmem:[#allocation7 + $0x128] sm:$0xff] %v1497_v59 }
 0x295   :  { %1562 = vst [vmem:[#allocation7 + $0x130] sm:$0xff] %v1498_v34  ;;  %1563 = vst [vmem:[#allocation7 + $0x138] sm:$0xff] %v1499_v45 }
 0x296   :  { %1564 = vst [vmem:[#allocation7 + $0x140] sm:$0xff] %v1500_v50  ;;  %1565 = vst [vmem:[#allocation7 + $0x148] sm:$0xff] %v1501_v47 }
 0x297   :  { %1566 = vst [vmem:[#allocation7 + $0x150] sm:$0xff] %v1502_v10  ;;  %1567 = vst [vmem:[#allocation7 + $0x158] sm:$0xff] %v1503_v52 }
 0x298   :  { %1568 = vst [vmem:[#allocation7 + $0x160] sm:$0xff] %v1504_v57  ;;  %1569 = vst [vmem:[#allocation7 + $0x168] sm:$0xff] %v1505_v17 }
 0x299   :  { %1570 = vst [vmem:[#allocation7 + $0x170] sm:$0xff] %v1506_v41  ;;  %1571 = vst [vmem:[#allocation7 + $0x178] sm:$0xff] %v1507_v15 }
 0x29a   :  { %1572 = vst [vmem:[#allocation7 + $0x180] sm:$0xff] %v1508_v60  ;;  %1573 = vst [vmem:[#allocation7 + $0x188] sm:$0xff] %v1509_v62 }
 0x29b   :  { %1574 = vst [vmem:[#allocation7 + $0x190] sm:$0xff] %v1510_v39  ;;  %1575 = vst [vmem:[#allocation7 + $0x198] sm:$0xff] %v1511_v8 }
 0x29c   :  { %1576 = vst [vmem:[#allocation7 + $0x1a0] sm:$0xff] %v1512_v2  ;;  %1577 = vst [vmem:[#allocation7 + $0x1a8] sm:$0xff] %v1513_v24 }
 0x29d   :  { %1578 = vst [vmem:[#allocation7 + $0x1b0] sm:$0xff] %v1514_v58  ;;  %1579 = vst [vmem:[#allocation7 + $0x1b8] sm:$0xff] %v1515_v61 }
 0x29e   :  { %1580 = vst [vmem:[#allocation7 + $0x1c0] sm:$0xff] %v1516_v14  ;;  %1581 = vst [vmem:[#allocation7 + $0x1c8] sm:$0xff] %v1517_v1 }
 0x29f   :  { %1582 = vst [vmem:[#allocation7 + $0x1d0] sm:$0xff] %v1518_v4  ;;  %1583 = vst [vmem:[#allocation7 + $0x1d8] sm:$0xff] %v1519_v0 }
 0x2a0   :  { %1584 = vst [vmem:[#allocation7 + $0x1e0] sm:$0xff] %v1520_v6  ;;  %1586 = vst [vmem:[#allocation7 + $0x1f0] sm:$0xff] %v1522_v36 }
 0x2a1   :  { %1587 = vst [vmem:[#allocation7 + $0x1f8] sm:$0xff] %v1523_v31 }
 0x2a2   :  { %1889 = shalt.err (!%p1886_p6)
}
 0x2a3   :  { %s1890_s20 = scalar_lea.hbm %s3394_s4, 8192 }
 0x2a4   :  { %p1891_p7 = scmp.ne.s32.totalorder %s3394_s4, %s1890_s20  ;;  %p1894_p8 = scmp.lt.u32.totalorder %s1890_s20, %s3394_s4 }
 0x2a6   :  { %p1896_p9 = pnand %p1894_p8, %p1891_p7 }
 0x2a8   :  { %1899 = shalt.err (!%p1896_p9)
}
 0x2a9   :  { %s1911_s25 = smov 128   ;;  %s1912_s26 = smov 8  }
 0x2aa   :  { %1599 = dma.vmem_to_hbm [thread:$0]  %s3367_s3, 8192, %s3394_s4, [#allocation4], %s1911_s25, %s1911_s25, %s1912_s26  }
 0x2ab   :  { %1904 = dma.done.wait [#allocation4], 8192  }
 0x2ac   :  { %1905 = vsyncadd [#allocation4], 4294959104 }
 0x2ad   :  { %1603 = vsyncpa [#allocation3], 1 }
 0x2ae   :  { %1604 = vsyncpa [#allocation6], 1 }
 0x2af   :  { %1605 = vsyncpa [#allocation4], 1 }

</bundles_post_ra>
